<compile_context>
chip_gen: v6e
topology: v6e:2x2x1
jax: 0.10.0
libtpu: 0.0.40
codegen_flags: <defaults>
</compile_context>

<pallas_src>
import jax
import jax.numpy as jnp
from jax.experimental import pallas as pl
from jax.experimental.pallas import tpu as pltpu


# ----------------------------------------------------------------------------
# BlockSpec helpers
# ----------------------------------------------------------------------------
def _const_spec(shape):
    nd = len(shape)
    return pl.BlockSpec(shape, lambda t, _nd=nd: (0,) * _nd)


# ----------------------------------------------------------------------------
# fused per-T-step kernel (grid = (T,), state carried in VMEM scratch)
# ----------------------------------------------------------------------------
def csi_fused_kernel(
        # ---- constant inputs ----
        hrep_re_ref, hrep_im_ref, q0_re_ref,
        vrep_re_ref, vrep_im_ref, vrept_re_ref, vrept_im_ref,
        sel_a_ref, sel_r_ref, tile_b_ref,
        wqa_ref, wqb_ref, wqc_ref, wqm_ref, wqh_ref, bq_ref,
        wha_ref, whb_ref, whc_ref, whm_ref, whh_ref, bh_ref,
        wqfc_ref, bqfc_ref,
        wcsi_re_ref, wcsi_im_ref, bcsi_re_ref, bcsi_im_ref,
        wbasis_ref, bbasis_ref,
        # ---- per-step outputs (T-indexed slabs) ----
        qs_re_ref, qs_im_ref, p_re_ref, p_im_ref,
        csi_re_ref, csi_im_ref, cqi_ref, m_ref,
        # ---- recurrent state in VMEM scratch ----
        q_re_s, q_im_s, hq_s, hh_s):
    f32 = jnp.float32
    t = pl.program_id(0)

    # ---- t == 0 : Q = eye(Na, Np), zero hidden state ------------------------
    @pl.when(t == 0)
    def _init():
        q_re_s[...] = q0_re_ref[...]
        q_im_s[...] = jnp.zeros_like(q_im_s)
        hq_s[...] = jnp.zeros_like(hq_s)
        hh_s[...] = jnp.zeros_like(hh_s)

    q_re = q_re_s[...]                      # (B, Na*Np)  lane-dense raw Q
    q_im = q_im_s[...]

    sel_a = sel_a_ref[...]                  # (Na*Np, Na): 1 if lane//Np == a
    na = sel_a.shape[1]
    npp = q_re.shape[1] // na               # Np
    n_cw = vrep_re_ref.shape[1]             # codebook size nV

    # ---- Q = Q / ||Q||_F  (complex Frobenius norm, per batch) ---------------
    sq = jnp.sum(q_re * q_re + q_im * q_im, axis=1, keepdims=True)
    inv_f = jax.lax.rsqrt(sq)
    qn_re = q_re * inv_f
    qn_im = q_im * inv_f
    qs_re_ref[...] = qn_re                  # Q_pre streamed to the T slab
    qs_im_ref[...] = qn_im

    # ---- UE feedback ---------------------------------------------------------
    # E[b, a*Np+p] = H[b,a] * Qn[b,a,p]  (He[b,p] = sum of lanes with lane%Np==p)
    hrep_re = hrep_re_ref[...]
    hrep_im = hrep_im_ref[...]
    e_re = hrep_re * qn_re - hrep_im * qn_im
    e_im = hrep_re * qn_im + hrep_im * qn_re

    # prod = He @ V  computed as E @ Vrep,  Vrep[c, n] = V[c % Np, n]
    vr_re = vrep_re_ref[...]
    vr_im = vrep_im_ref[...]
    pr_re = (jnp.dot(e_re, vr_re, preferred_element_type=f32)
             - jnp.dot(e_im, vr_im, preferred_element_type=f32))
    pr_im = (jnp.dot(e_re, vr_im, preferred_element_type=f32)
             + jnp.dot(e_im, vr_re, preferred_element_type=f32))
    mag = pr_re * pr_re + pr_im * pr_im     # (B, nV), monotone in |prod|

    bsz = mag.shape[0]
    idx = jax.lax.broadcasted_iota(jnp.int32, (bsz, n_cw), 1)
    mx = jnp.max(mag, axis=1, keepdims=True)
    m_sel = jnp.min(jnp.where(mag == mx, idx, n_cw), axis=1)[:, None]  # (B,1)
    m_ref[...] = m_sel                      # first-max index

    # vrep[b, c] = V[c % Np, m[b]]  via one-hot @ Vrep.T  (lane-dense codeword)
    onehot = (idx == m_sel).astype(f32)
    v_re = jnp.dot(onehot, vrept_re_ref[...], preferred_element_type=f32)
    v_im = jnp.dot(onehot, vrept_im_ref[...], preferred_element_type=f32)

    # cqi = |He @ v| = |sum_lanes E * vrep|
    c_re = jnp.sum(e_re * v_re - e_im * v_im, axis=1, keepdims=True)
    c_im = jnp.sum(e_re * v_im + e_im * v_re, axis=1, keepdims=True)
    cqi = jnp.sqrt(c_re * c_re + c_im * c_im)        # (B, 1)
    cqi_ref[...] = cqi                               # quantizer 'none' == identity

    # p = Q @ v : grouped lane reduction over Np routed to the MXU via sel_a
    a_re = qn_re * v_re - qn_im * v_im
    a_im = qn_re * v_im + qn_im * v_re
    p_re_ref[...] = jnp.dot(a_re, sel_a, preferred_element_type=f32)
    p_im_ref[...] = jnp.dot(a_im, sel_a, preferred_element_type=f32)

    # ---- cell stand-in (recurrent tanh features) -----------------------------
    mq_re = jnp.dot(qn_re, sel_a, preferred_element_type=f32) * (1.0 / npp)
    mq_im = jnp.dot(qn_im, sel_a, preferred_element_type=f32) * (1.0 / npp)
    m_norm = m_sel.astype(f32) * (1.0 / n_cw)        # (B, 1)

    hq = jnp.tanh(jnp.dot(mq_re, wqa_ref[...], preferred_element_type=f32)
                  + jnp.dot(mq_im, wqb_ref[...], preferred_element_type=f32)
                  + cqi * wqc_ref[...]
                  + m_norm * wqm_ref[...]
                  + jnp.dot(hq_s[...], wqh_ref[...], preferred_element_type=f32)
                  + bq_ref[...])
    hh = jnp.tanh(jnp.dot(mq_re, wha_ref[...], preferred_element_type=f32)
                  + jnp.dot(mq_im, whb_ref[...], preferred_element_type=f32)
                  + cqi * whc_ref[...]
                  + m_norm * whm_ref[...]
                  + jnp.dot(hh_s[...], whh_ref[...], preferred_element_type=f32)
                  + bh_ref[...])
    hq_s[...] = hq
    hh_s[...] = hh

    # ---- FC heads -------------------------------------------------------------
    # Q head: columns laid out as [re plane | im plane] (128-aligned halves).
    q_next = jnp.dot(hq, wqfc_ref[...], preferred_element_type=f32) + bqfc_ref[...]
    half_q = q_next.shape[1] // 2
    q_re_s[...] = q_next[:, :half_q]        # raw Q consumed by the next step
    q_im_s[...] = q_next[:, half_q:]

    csi_v_re = jnp.dot(hh, wcsi_re_ref[...], preferred_element_type=f32) + bcsi_re_ref[...]
    csi_v_im = jnp.dot(hh, wcsi_im_ref[...], preferred_element_type=f32) + bcsi_im_ref[...]

    r_flat = jnp.dot(hh, wbasis_ref[...], preferred_element_type=f32) + bbasis_ref[...]
    half_r = r_flat.shape[1] // 2
    r_re = r_flat[:, :half_r]               # (B, 32*nB), row-major (row, col)
    r_im = r_flat[:, half_r:]

    # R row-normalization + complex matvec R @ csi, grouped lane ops on the MXU.
    sel_r = sel_r_ref[...]                  # (32*nB, 32): 1 if lane//nB == row
    tile_b = tile_b_ref[...]                # (nB, 32*nB): 1 if lane%nB  == col
    nrm = jnp.dot(r_re * r_re + r_im * r_im, sel_r, preferred_element_type=f32)
    inv_r = jax.lax.rsqrt(nrm)              # (B, 32)  (scale folded after matvec)
    cr_re = jnp.dot(csi_v_re, tile_b, preferred_element_type=f32)   # (B, 32*nB)
    cr_im = jnp.dot(csi_v_im, tile_b, preferred_element_type=f32)
    csi_re_ref[...] = jnp.dot(r_re * cr_re - r_im * cr_im, sel_r,
                              preferred_element_type=f32) * inv_r
    csi_im_ref[...] = jnp.dot(r_re * cr_im + r_im * cr_re, sel_r,
                              preferred_element_type=f32) * inv_r


# ----------------------------------------------------------------------------
# CSIModel forward: single pallas_call over grid=(T,)
# ----------------------------------------------------------------------------
def csi_model_forward(H, R_unused, params, T):
    """H: (B, Na, 2) float32 re/im pairs.  Returns (csi_pres, ps, cqis, Qs, ms)."""
    del R_unused                              # R is recomputed inside the cell
    f32 = jnp.float32
    Na, Np, nV, nB, hidden = (params["Na"], params["Np"], params["nV"],
                              params["nB"], params["hidden"])
    B = H.shape[0]
    n_flat = Na * Np
    n_r = 32 * nB

    # constants prepared once (outside the kernel)
    h_re, h_im = H[..., 0], H[..., 1]                         # (B, Na)
    hrep_re = jnp.repeat(h_re, Np, axis=1)                    # (B, Na*Np)
    hrep_im = jnp.repeat(h_im, Np, axis=1)
    q0_re = jnp.tile(jnp.eye(Na, Np, dtype=f32).reshape(1, n_flat), (B, 1))

    vrep_re = jnp.tile(params["V_re"], (Na, 1))               # (Na*Np, nV)
    vrep_im = jnp.tile(params["V_im"], (Na, 1))
    vrept_re = vrep_re.T                                      # (nV, Na*Np)
    vrept_im = vrep_im.T

    lane_q = jnp.arange(n_flat)
    sel_a = (lane_q[:, None] // Np == jnp.arange(Na)[None, :]).astype(f32)
    lane_r = jnp.arange(n_r)
    sel_r = (lane_r[:, None] // nB == jnp.arange(32)[None, :]).astype(f32)
    tile_b = (lane_r[None, :] % nB == jnp.arange(nB)[:, None]).astype(f32)

    inputs = (hrep_re, hrep_im, q0_re,
              vrep_re, vrep_im, vrept_re, vrept_im,
              sel_a, sel_r, tile_b,
              params["WqA"], params["WqB"], params["wqc"], params["wqm"],
              params["WqH"], params["bq"],
              params["WhA"], params["WhB"], params["whc"], params["whm"],
              params["WhH"], params["bh"],
              params["W_qfc"], params["b_qfc"],
              params["Wcsi_re"], params["Wcsi_im"],
              params["bcsi_re"], params["bcsi_im"],
              params["W_basis"], params["b_basis"])

    out_shape = (
        jax.ShapeDtypeStruct((T, B, n_flat), f32),   # normalized Q (re)
        jax.ShapeDtypeStruct((T, B, n_flat), f32),   # normalized Q (im)
        jax.ShapeDtypeStruct((T, B, Na), f32),       # p (re)
        jax.ShapeDtypeStruct((T, B, Na), f32),       # p (im)
        jax.ShapeDtypeStruct((T, B, 32), f32),       # csi_next (re)
        jax.ShapeDtypeStruct((T, B, 32), f32),       # csi_next (im)
        jax.ShapeDtypeStruct((T, B, 1), f32),        # cqi
        jax.ShapeDtypeStruct((T, B, 1), jnp.int32),  # m
    )
    out_specs = tuple(
        pl.BlockSpec((None, B, s.shape[2]), lambda t: (t, 0, 0))
        for s in out_shape)

    (qs_re, qs_im, p_re, p_im,
     csi_re, csi_im, cqi_out, m_out) = pl.pallas_call(
        csi_fused_kernel,
        grid=(T,),
        in_specs=[_const_spec(x.shape) for x in inputs],
        out_specs=out_specs,
        out_shape=out_shape,
        scratch_shapes=[pltpu.VMEM((B, n_flat), f32),   # raw Q (re) carry
                        pltpu.VMEM((B, n_flat), f32),   # raw Q (im) carry
                        pltpu.VMEM((B, hidden), f32),   # hQ carry
                        pltpu.VMEM((B, hidden), f32)],  # hH carry
        compiler_params=pltpu.CompilerParams(
            dimension_semantics=("arbitrary",)),
    )(*inputs)

    # reassemble reference-shaped outputs once, outside the kernel
    Qs = jnp.transpose((qs_re + 1j * qs_im).reshape(T, B, Na, Np), (1, 0, 2, 3))
    csi_pres = csi_re + 1j * csi_im                       # (T, B, 32) complex
    p_c = p_re + 1j * p_im                                # (T, B, Na)
    ps = [p_c[t][:, :, None] for t in range(T)]           # list of (B, Na, 1)
    cqis = [cqi_out[t, :, 0] for t in range(T)]           # list of (B,)
    ms = jnp.transpose(m_out[:, :, 0], (1, 0))            # (B, T) int32
    return csi_pres, ps, cqis, Qs, ms


# ----------------------------------------------------------------------------
# deterministic parameter init + demo
# ----------------------------------------------------------------------------
def init_params(key, Na, Np, nV, nB, hidden):
    ks = jax.random.split(key, 20)
    f32 = jnp.float32
    nrm = jax.random.normal
    return {
        "Na": Na, "Np": Np, "nV": nV, "nB": nB, "hidden": hidden,
        # codebook (stand-in for the .mat file)
        "V_re": nrm(ks[0], (Np, nV), f32),
        "V_im": nrm(ks[1], (Np, nV), f32),
        # cell stand-in: h = tanh([mean_re, mean_im, cqi, m/nV, h_prev] . W + b)
        "WqA": 0.1 * nrm(ks[2], (Na, hidden), f32),
        "WqB": 0.1 * nrm(ks[3], (Na, hidden), f32),
        "wqc": 0.1 * nrm(ks[4], (1, hidden), f32),
        "wqm": 0.1 * nrm(ks[5], (1, hidden), f32),
        "WqH": 0.1 * nrm(ks[6], (hidden, hidden), f32),
        "bq": jnp.zeros((1, hidden), f32),
        "WhA": 0.1 * nrm(ks[7], (Na, hidden), f32),
        "WhB": 0.1 * nrm(ks[8], (Na, hidden), f32),
        "whc": 0.1 * nrm(ks[9], (1, hidden), f32),
        "whm": 0.1 * nrm(ks[10], (1, hidden), f32),
        "WhH": 0.1 * nrm(ks[11], (hidden, hidden), f32),
        "bh": jnp.zeros((1, hidden), f32),
        # FC heads; complex outputs laid out as [re | im] contiguous halves
        "W_qfc": 0.1 * nrm(ks[12], (hidden, 2 * Na * Np), f32),
        "b_qfc": jnp.zeros((1, 2 * Na * Np), f32),
        "Wcsi_re": 0.1 * nrm(ks[13], (hidden, nB), f32),
        "Wcsi_im": 0.1 * nrm(ks[14], (hidden, nB), f32),
        "bcsi_re": jnp.zeros((1, nB), f32),
        "bcsi_im": jnp.zeros((1, nB), f32),
        "W_basis": 0.1 * nrm(ks[15], (hidden, 2 * 32 * nB), f32),
        "b_basis": 0.1 * nrm(ks[16], (1, 2 * 32 * nB), f32),
    }


if __name__ == "__main__":
    B, Na, Np, nV, nB, hidden, T = 2, 32, 4, 16, 8, 32, 3   # Na*Np = 128 lanes

    key = jax.random.PRNGKey(0)
    k_param, k_h = jax.random.split(key, 2)
    params = init_params(k_param, Na, Np, nV, nB, hidden)

    H = jax.random.normal(k_h, (B, Na, 2), jnp.float32)      # channel re/im pairs
    R = jnp.zeros((B, 32, nB, 2), jnp.float32)               # unused (recomputed)

    csi_pres, ps, cqis, Qs, ms = csi_model_forward(H, R, params, T)

    jax.block_until_ready(csi_pres)
    jax.block_until_ready(Qs)
    jax.block_until_ready(ms)
    jax.block_until_ready(ps[0])
    jax.block_until_ready(cqis[0])

    assert csi_pres.shape == (T, B, 32)
    assert Qs.shape == (B, T, Na, Np)
    assert ms.shape == (B, T)
    assert ps[0].shape == (B, Na, 1)
    assert cqis[0].shape == (B,)
    print("KERNEL_OK")
</pallas_src>

<mosaic_0001>
module attributes {stable_mosaic.version = 11 : i64} {
  func.func @csi_fused_kernel(%arg0: i32, %arg1: memref<2x128xf32, #tpu.memory_space<vmem>>, %arg2: memref<2x128xf32, #tpu.memory_space<vmem>>, %arg3: memref<2x128xf32, #tpu.memory_space<vmem>>, %arg4: memref<128x16xf32, #tpu.memory_space<vmem>>, %arg5: memref<128x16xf32, #tpu.memory_space<vmem>>, %arg6: memref<16x128xf32, #tpu.memory_space<vmem>>, %arg7: memref<16x128xf32, #tpu.memory_space<vmem>>, %arg8: memref<128x32xf32, #tpu.memory_space<vmem>>, %arg9: memref<256x32xf32, #tpu.memory_space<vmem>>, %arg10: memref<8x256xf32, #tpu.memory_space<vmem>>, %arg11: memref<32x32xf32, #tpu.memory_space<vmem>>, %arg12: memref<32x32xf32, #tpu.memory_space<vmem>>, %arg13: memref<1x32xf32, #tpu.memory_space<vmem>>, %arg14: memref<1x32xf32, #tpu.memory_space<vmem>>, %arg15: memref<32x32xf32, #tpu.memory_space<vmem>>, %arg16: memref<1x32xf32, #tpu.memory_space<vmem>>, %arg17: memref<32x32xf32, #tpu.memory_space<vmem>>, %arg18: memref<32x32xf32, #tpu.memory_space<vmem>>, %arg19: memref<1x32xf32, #tpu.memory_space<vmem>>, %arg20: memref<1x32xf32, #tpu.memory_space<vmem>>, %arg21: memref<32x32xf32, #tpu.memory_space<vmem>>, %arg22: memref<1x32xf32, #tpu.memory_space<vmem>>, %arg23: memref<32x256xf32, #tpu.memory_space<vmem>>, %arg24: memref<1x256xf32, #tpu.memory_space<vmem>>, %arg25: memref<32x8xf32, #tpu.memory_space<vmem>>, %arg26: memref<32x8xf32, #tpu.memory_space<vmem>>, %arg27: memref<1x8xf32, #tpu.memory_space<vmem>>, %arg28: memref<1x8xf32, #tpu.memory_space<vmem>>, %arg29: memref<32x512xf32, #tpu.memory_space<vmem>>, %arg30: memref<1x512xf32, #tpu.memory_space<vmem>>, %arg31: memref<1x2x128xf32, #tpu.memory_space<vmem>>, %arg32: memref<1x2x128xf32, #tpu.memory_space<vmem>>, %arg33: memref<1x2x32xf32, #tpu.memory_space<vmem>>, %arg34: memref<1x2x32xf32, #tpu.memory_space<vmem>>, %arg35: memref<1x2x32xf32, #tpu.memory_space<vmem>>, %arg36: memref<1x2x32xf32, #tpu.memory_space<vmem>>, %arg37: memref<1x2x1xf32, #tpu.memory_space<vmem>>, %arg38: memref<1x2x1xi32, #tpu.memory_space<vmem>>, %arg39: memref<2x128xf32, #tpu.memory_space<vmem>>, %arg40: memref<2x128xf32, #tpu.memory_space<vmem>>, %arg41: memref<2x32xf32, #tpu.memory_space<vmem>>, %arg42: memref<2x32xf32, #tpu.memory_space<vmem>>) attributes {dimension_semantics = [#tpu.dimension_semantics<arbitrary>], iteration_bounds = array<i64: 3>, scalar_prefetch = 0 : i64, scratch_operands = 4 : i64, tpu.core_type = #tpu.core_type<tc>, window_params = [{pipeline_mode = #tpu.pipeline_mode<synchronous>, transform_indices = @transform_0, window_bounds = array<i64: 2, 128>}, {pipeline_mode = #tpu.pipeline_mode<synchronous>, transform_indices = @transform_1, window_bounds = array<i64: 2, 128>}, {pipeline_mode = #tpu.pipeline_mode<synchronous>, transform_indices = @transform_2, window_bounds = array<i64: 2, 128>}, {pipeline_mode = #tpu.pipeline_mode<synchronous>, transform_indices = @transform_3, window_bounds = array<i64: 128, 16>}, {pipeline_mode = #tpu.pipeline_mode<synchronous>, transform_indices = @transform_4, window_bounds = array<i64: 128, 16>}, {pipeline_mode = #tpu.pipeline_mode<synchronous>, transform_indices = @transform_5, window_bounds = array<i64: 16, 128>}, {pipeline_mode = #tpu.pipeline_mode<synchronous>, transform_indices = @transform_6, window_bounds = array<i64: 16, 128>}, {pipeline_mode = #tpu.pipeline_mode<synchronous>, transform_indices = @transform_7, window_bounds = array<i64: 128, 32>}, {pipeline_mode = #tpu.pipeline_mode<synchronous>, transform_indices = @transform_8, window_bounds = array<i64: 256, 32>}, {pipeline_mode = #tpu.pipeline_mode<synchronous>, transform_indices = @transform_9, window_bounds = array<i64: 8, 256>}, {pipeline_mode = #tpu.pipeline_mode<synchronous>, transform_indices = @transform_10, window_bounds = array<i64: 32, 32>}, {pipeline_mode = #tpu.pipeline_mode<synchronous>, transform_indices = @transform_11, window_bounds = array<i64: 32, 32>}, {pipeline_mode = #tpu.pipeline_mode<synchronous>, transform_indices = @transform_12, window_bounds = array<i64: 1, 32>}, {pipeline_mode = #tpu.pipeline_mode<synchronous>, transform_indices = @transform_13, window_bounds = array<i64: 1, 32>}, {pipeline_mode = #tpu.pipeline_mode<synchronous>, transform_indices = @transform_14, window_bounds = array<i64: 32, 32>}, {pipeline_mode = #tpu.pipeline_mode<synchronous>, transform_indices = @transform_15, window_bounds = array<i64: 1, 32>}, {pipeline_mode = #tpu.pipeline_mode<synchronous>, transform_indices = @transform_16, window_bounds = array<i64: 32, 32>}, {pipeline_mode = #tpu.pipeline_mode<synchronous>, transform_indices = @transform_17, window_bounds = array<i64: 32, 32>}, {pipeline_mode = #tpu.pipeline_mode<synchronous>, transform_indices = @transform_18, window_bounds = array<i64: 1, 32>}, {pipeline_mode = #tpu.pipeline_mode<synchronous>, transform_indices = @transform_19, window_bounds = array<i64: 1, 32>}, {pipeline_mode = #tpu.pipeline_mode<synchronous>, transform_indices = @transform_20, window_bounds = array<i64: 32, 32>}, {pipeline_mode = #tpu.pipeline_mode<synchronous>, transform_indices = @transform_21, window_bounds = array<i64: 1, 32>}, {pipeline_mode = #tpu.pipeline_mode<synchronous>, transform_indices = @transform_22, window_bounds = array<i64: 32, 256>}, {pipeline_mode = #tpu.pipeline_mode<synchronous>, transform_indices = @transform_23, window_bounds = array<i64: 1, 256>}, {pipeline_mode = #tpu.pipeline_mode<synchronous>, transform_indices = @transform_24, window_bounds = array<i64: 32, 8>}, {pipeline_mode = #tpu.pipeline_mode<synchronous>, transform_indices = @transform_25, window_bounds = array<i64: 32, 8>}, {pipeline_mode = #tpu.pipeline_mode<synchronous>, transform_indices = @transform_26, window_bounds = array<i64: 1, 8>}, {pipeline_mode = #tpu.pipeline_mode<synchronous>, transform_indices = @transform_27, window_bounds = array<i64: 1, 8>}, {pipeline_mode = #tpu.pipeline_mode<synchronous>, transform_indices = @transform_28, window_bounds = array<i64: 32, 512>}, {pipeline_mode = #tpu.pipeline_mode<synchronous>, transform_indices = @transform_29, window_bounds = array<i64: 1, 512>}, {transform_indices = @transform_30, window_bounds = array<i64: 1, 2, 128>}, {transform_indices = @transform_31, window_bounds = array<i64: 1, 2, 128>}, {transform_indices = @transform_32, window_bounds = array<i64: 1, 2, 32>}, {transform_indices = @transform_33, window_bounds = array<i64: 1, 2, 32>}, {transform_indices = @transform_34, window_bounds = array<i64: 1, 2, 32>}, {transform_indices = @transform_35, window_bounds = array<i64: 1, 2, 32>}, {transform_indices = @transform_36, window_bounds = array<i64: 1, 2, 1>}, {transform_indices = @transform_37, window_bounds = array<i64: 1, 2, 1>}]} {
    %c0_i32 = arith.constant 0 : i32
    %0 = arith.cmpi eq, %arg0, %c0_i32 : i32
    %1 = arith.extui %0 : i1 to i32
    %c0_i32_0 = arith.constant 0 : i32
    %2 = arith.cmpi ne, %1, %c0_i32_0 : i32
    scf.if %2 {
      %c0_130 = arith.constant 0 : index
      %c0_131 = arith.constant 0 : index
      %200 = vector.load %arg3[%c0_130, %c0_131] : memref<2x128xf32, #tpu.memory_space<vmem>>, vector<2x128xf32>
      %c0_132 = arith.constant 0 : index
      %c0_133 = arith.constant 0 : index
      %201 = vector.load %arg39[%c0_132, %c0_133] : memref<2x128xf32, #tpu.memory_space<vmem>>, vector<2x128xf32>
      tpu.vector_store %arg39[%c0_132, %c0_133], %200 {strides = array<i32>} : memref<2x128xf32, #tpu.memory_space<vmem>>, vector<2x128xf32>,
      %cst_134 = arith.constant 0.000000e+00 : f32
      %202 = vector.broadcast %cst_134 : f32 to vector<2x128xf32>
      %c0_135 = arith.constant 0 : index
      %c0_136 = arith.constant 0 : index
      %203 = vector.load %arg40[%c0_135, %c0_136] : memref<2x128xf32, #tpu.memory_space<vmem>>, vector<2x128xf32>
      tpu.vector_store %arg40[%c0_135, %c0_136], %202 {strides = array<i32>} : memref<2x128xf32, #tpu.memory_space<vmem>>, vector<2x128xf32>,
      %cst_137 = arith.constant 0.000000e+00 : f32
      %204 = vector.broadcast %cst_137 : f32 to vector<2x32xf32>
      %c0_138 = arith.constant 0 : index
      %c0_139 = arith.constant 0 : index
      %205 = vector.load %arg41[%c0_138, %c0_139] : memref<2x32xf32, #tpu.memory_space<vmem>>, vector<2x32xf32>
      tpu.vector_store %arg41[%c0_138, %c0_139], %204 {strides = array<i32>} : memref<2x32xf32, #tpu.memory_space<vmem>>, vector<2x32xf32>,
      %cst_140 = arith.constant 0.000000e+00 : f32
      %206 = vector.broadcast %cst_140 : f32 to vector<2x32xf32>
      %c0_141 = arith.constant 0 : index
      %c0_142 = arith.constant 0 : index
      %207 = vector.load %arg42[%c0_141, %c0_142] : memref<2x32xf32, #tpu.memory_space<vmem>>, vector<2x32xf32>
      tpu.vector_store %arg42[%c0_141, %c0_142], %206 {strides = array<i32>} : memref<2x32xf32, #tpu.memory_space<vmem>>, vector<2x32xf32>,
    } else {
    }
    %c0 = arith.constant 0 : index
    %c0_1 = arith.constant 0 : index
    %3 = vector.load %arg39[%c0, %c0_1] : memref<2x128xf32, #tpu.memory_space<vmem>>, vector<2x128xf32>
    %c0_2 = arith.constant 0 : index
    %c0_3 = arith.constant 0 : index
    %4 = vector.load %arg40[%c0_2, %c0_3] : memref<2x128xf32, #tpu.memory_space<vmem>>, vector<2x128xf32>
    %c0_4 = arith.constant 0 : index
    %c0_5 = arith.constant 0 : index
    %5 = vector.load %arg8[%c0_4, %c0_5] : memref<128x32xf32, #tpu.memory_space<vmem>>, vector<128x32xf32>
    %6 = arith.mulf %3, %3 : vector<2x128xf32>
    %7 = arith.mulf %4, %4 : vector<2x128xf32>
    %8 = arith.addf %6, %7 : vector<2x128xf32>
    %cst = arith.constant dense<0.000000e+00> : vector<2xf32>
    %9 = vector.multi_reduction <add>, %8, %cst [1] : vector<2x128xf32> to vector<2xf32>
    %10 = vector.shape_cast %9 : vector<2xf32> to vector<2x1xf32>
    %11 = math.rsqrt %10 : vector<2x1xf32>
    %12 = vector.broadcast %11 : vector<2x1xf32> to vector<2x128xf32>
    %13 = arith.mulf %3, %12 : vector<2x128xf32>
    %14 = vector.broadcast %11 : vector<2x1xf32> to vector<2x128xf32>
    %15 = arith.mulf %4, %14 : vector<2x128xf32>
    %c0_6 = arith.constant 0 : index
    %c0_7 = arith.constant 0 : index
    %c0_8 = arith.constant 0 : index
    %16 = vector.load %arg31[%c0_6, %c0_7, %c0_8] : memref<1x2x128xf32, #tpu.memory_space<vmem>>, vector<1x2x128xf32>
    %17 = vector.shape_cast %16 : vector<1x2x128xf32> to vector<2x128xf32>
    %18 = vector.shape_cast %13 : vector<2x128xf32> to vector<1x2x128xf32>
    tpu.vector_store %arg31[%c0_6, %c0_7, %c0_8], %18 {strides = array<i32>} : memref<1x2x128xf32, #tpu.memory_space<vmem>>, vector<1x2x128xf32>,
    %c0_9 = arith.constant 0 : index
    %c0_10 = arith.constant 0 : index
    %c0_11 = arith.constant 0 : index
    %19 = vector.load %arg32[%c0_9, %c0_10, %c0_11] : memref<1x2x128xf32, #tpu.memory_space<vmem>>, vector<1x2x128xf32>
    %20 = vector.shape_cast %19 : vector<1x2x128xf32> to vector<2x128xf32>
    %21 = vector.shape_cast %15 : vector<2x128xf32> to vector<1x2x128xf32>
    tpu.vector_store %arg32[%c0_9, %c0_10, %c0_11], %21 {strides = array<i32>} : memref<1x2x128xf32, #tpu.memory_space<vmem>>, vector<1x2x128xf32>,
    %c0_12 = arith.constant 0 : index
    %c0_13 = arith.constant 0 : index
    %22 = vector.load %arg1[%c0_12, %c0_13] : memref<2x128xf32, #tpu.memory_space<vmem>>, vector<2x128xf32>
    %c0_14 = arith.constant 0 : index
    %c0_15 = arith.constant 0 : index
    %23 = vector.load %arg2[%c0_14, %c0_15] : memref<2x128xf32, #tpu.memory_space<vmem>>, vector<2x128xf32>
    %24 = arith.mulf %22, %13 : vector<2x128xf32>
    %25 = arith.mulf %23, %15 : vector<2x128xf32>
    %26 = arith.subf %24, %25 : vector<2x128xf32>
    %27 = arith.mulf %22, %15 : vector<2x128xf32>
    %28 = arith.mulf %23, %13 : vector<2x128xf32>
    %29 = arith.addf %27, %28 : vector<2x128xf32>
    %c0_16 = arith.constant 0 : index
    %c0_17 = arith.constant 0 : index
    %30 = vector.load %arg4[%c0_16, %c0_17] : memref<128x16xf32, #tpu.memory_space<vmem>>, vector<128x16xf32>
    %c0_18 = arith.constant 0 : index
    %c0_19 = arith.constant 0 : index
    %31 = vector.load %arg5[%c0_18, %c0_19] : memref<128x16xf32, #tpu.memory_space<vmem>>, vector<128x16xf32>
    %cst_20 = arith.constant dense<0.000000e+00> : vector<2x16xf32>
    %32 = tpu.matmul %26, %30, %cst_20 {dimension_numbers = #tpu.dot_dimension_numbers<[1], [0], [0], [1], [0, 0, 1, 1], [], []>} : vector<2x128xf32>, vector<128x16xf32>, vector<2x16xf32> -> vector<2x16xf32>
    %cst_21 = arith.constant dense<0.000000e+00> : vector<2x16xf32>
    %33 = tpu.matmul %29, %31, %cst_21 {dimension_numbers = #tpu.dot_dimension_numbers<[1], [0], [0], [1], [0, 0, 1, 1], [], []>} : vector<2x128xf32>, vector<128x16xf32>, vector<2x16xf32> -> vector<2x16xf32>
    %34 = arith.subf %32, %33 : vector<2x16xf32>
    %cst_22 = arith.constant dense<0.000000e+00> : vector<2x16xf32>
    %35 = tpu.matmul %26, %31, %cst_22 {dimension_numbers = #tpu.dot_dimension_numbers<[1], [0], [0], [1], [0, 0, 1, 1], [], []>} : vector<2x128xf32>, vector<128x16xf32>, vector<2x16xf32> -> vector<2x16xf32>
    %cst_23 = arith.constant dense<0.000000e+00> : vector<2x16xf32>
    %36 = tpu.matmul %29, %30, %cst_23 {dimension_numbers = #tpu.dot_dimension_numbers<[1], [0], [0], [1], [0, 0, 1, 1], [], []>} : vector<2x128xf32>, vector<128x16xf32>, vector<2x16xf32> -> vector<2x16xf32>
    %37 = arith.addf %35, %36 : vector<2x16xf32>
    %38 = arith.mulf %34, %34 : vector<2x16xf32>
    %39 = arith.mulf %37, %37 : vector<2x16xf32>
    %40 = arith.addf %38, %39 : vector<2x16xf32>
    %41 = tpu.iota {dimensions = array<i32: 1>} : vector<2x16xi32>
    %cst_24 = arith.constant dense<0xFF800000> : vector<2xf32>
    %42 = vector.multi_reduction <maximumf>, %40, %cst_24 [1] : vector<2x16xf32> to vector<2xf32>
    %43 = vector.shape_cast %42 : vector<2xf32> to vector<2x1xf32>
    %44 = vector.broadcast %43 : vector<2x1xf32> to vector<2x16xf32>
    %45 = arith.cmpf oeq, %40, %44 : vector<2x16xf32>
    %c16_i32 = arith.constant 16 : i32
    %46 = vector.broadcast %c16_i32 : i32 to vector<2x16xi32>
    %47 = arith.select %45, %41, %46 : vector<2x16xi1>, vector<2x16xi32>
    %cst_25 = arith.constant dense<2147483647> : vector<2xi32>
    %48 = vector.multi_reduction <minsi>, %47, %cst_25 [1] : vector<2x16xi32> to vector<2xi32>
    %49 = vector.shape_cast %48 : vector<2xi32> to vector<2x1xi32>
    %c0_26 = arith.constant 0 : index
    %c0_27 = arith.constant 0 : index
    %c0_28 = arith.constant 0 : index
    %50 = vector.load %arg38[%c0_26, %c0_27, %c0_28] : memref<1x2x1xi32, #tpu.memory_space<vmem>>, vector<1x2x1xi32>
    %51 = vector.shape_cast %50 : vector<1x2x1xi32> to vector<2x1xi32>
    %52 = vector.shape_cast %49 : vector<2x1xi32> to vector<1x2x1xi32>
    tpu.vector_store %arg38[%c0_26, %c0_27, %c0_28], %52 {strides = array<i32>} : memref<1x2x1xi32, #tpu.memory_space<vmem>>, vector<1x2x1xi32>,
    %53 = vector.broadcast %49 : vector<2x1xi32> to vector<2x16xi32>
    %54 = arith.cmpi eq, %41, %53 : vector<2x16xi32>
    %55 = arith.extui %54 : vector<2x16xi1> to vector<2x16xi32>
    %56 = arith.sitofp %55 : vector<2x16xi32> to vector<2x16xf32>
    %c0_29 = arith.constant 0 : index
    %c0_30 = arith.constant 0 : index
    %57 = vector.load %arg6[%c0_29, %c0_30] : memref<16x128xf32, #tpu.memory_space<vmem>>, vector<16x128xf32>
    %cst_31 = arith.constant dense<0.000000e+00> : vector<2x128xf32>
    %58 = tpu.matmul %56, %57, %cst_31 {dimension_numbers = #tpu.dot_dimension_numbers<[1], [0], [0], [1], [0, 0, 1, 1], [], []>} : vector<2x16xf32>, vector<16x128xf32>, vector<2x128xf32> -> vector<2x128xf32>
    %c0_32 = arith.constant 0 : index
    %c0_33 = arith.constant 0 : index
    %59 = vector.load %arg7[%c0_32, %c0_33] : memref<16x128xf32, #tpu.memory_space<vmem>>, vector<16x128xf32>
    %cst_34 = arith.constant dense<0.000000e+00> : vector<2x128xf32>
    %60 = tpu.matmul %56, %59, %cst_34 {dimension_numbers = #tpu.dot_dimension_numbers<[1], [0], [0], [1], [0, 0, 1, 1], [], []>} : vector<2x16xf32>, vector<16x128xf32>, vector<2x128xf32> -> vector<2x128xf32>
    %61 = arith.mulf %26, %58 : vector<2x128xf32>
    %62 = arith.mulf %29, %60 : vector<2x128xf32>
    %63 = arith.subf %61, %62 : vector<2x128xf32>
    %cst_35 = arith.constant dense<0.000000e+00> : vector<2xf32>
    %64 = vector.multi_reduction <add>, %63, %cst_35 [1] : vector<2x128xf32> to vector<2xf32>
    %65 = vector.shape_cast %64 : vector<2xf32> to vector<2x1xf32>
    %66 = arith.mulf %26, %60 : vector<2x128xf32>
    %67 = arith.mulf %29, %58 : vector<2x128xf32>
    %68 = arith.addf %66, %67 : vector<2x128xf32>
    %cst_36 = arith.constant dense<0.000000e+00> : vector<2xf32>
    %69 = vector.multi_reduction <add>, %68, %cst_36 [1] : vector<2x128xf32> to vector<2xf32>
    %70 = vector.shape_cast %69 : vector<2xf32> to vector<2x1xf32>
    %71 = arith.mulf %65, %65 : vector<2x1xf32>
    %72 = arith.mulf %70, %70 : vector<2x1xf32>
    %73 = arith.addf %71, %72 : vector<2x1xf32>
    %74 = math.sqrt %73 : vector<2x1xf32>
    %c0_37 = arith.constant 0 : index
    %c0_38 = arith.constant 0 : index
    %c0_39 = arith.constant 0 : index
    %75 = vector.load %arg37[%c0_37, %c0_38, %c0_39] : memref<1x2x1xf32, #tpu.memory_space<vmem>>, vector<1x2x1xf32>
    %76 = vector.shape_cast %75 : vector<1x2x1xf32> to vector<2x1xf32>
    %77 = vector.shape_cast %74 : vector<2x1xf32> to vector<1x2x1xf32>
    tpu.vector_store %arg37[%c0_37, %c0_38, %c0_39], %77 {strides = array<i32>} : memref<1x2x1xf32, #tpu.memory_space<vmem>>, vector<1x2x1xf32>,
    %78 = arith.mulf %13, %58 : vector<2x128xf32>
    %79 = arith.mulf %15, %60 : vector<2x128xf32>
    %80 = arith.subf %78, %79 : vector<2x128xf32>
    %81 = arith.mulf %13, %60 : vector<2x128xf32>
    %82 = arith.mulf %15, %58 : vector<2x128xf32>
    %83 = arith.addf %81, %82 : vector<2x128xf32>
    %cst_40 = arith.constant dense<0.000000e+00> : vector<2x32xf32>
    %84 = tpu.matmul %80, %5, %cst_40 {dimension_numbers = #tpu.dot_dimension_numbers<[1], [0], [0], [1], [0, 0, 1, 1], [], []>} : vector<2x128xf32>, vector<128x32xf32>, vector<2x32xf32> -> vector<2x32xf32>
    %c0_41 = arith.constant 0 : index
    %c0_42 = arith.constant 0 : index
    %c0_43 = arith.constant 0 : index
    %85 = vector.load %arg33[%c0_41, %c0_42, %c0_43] : memref<1x2x32xf32, #tpu.memory_space<vmem>>, vector<1x2x32xf32>
    %86 = vector.shape_cast %85 : vector<1x2x32xf32> to vector<2x32xf32>
    %87 = vector.shape_cast %84 : vector<2x32xf32> to vector<1x2x32xf32>
    tpu.vector_store %arg33[%c0_41, %c0_42, %c0_43], %87 {strides = array<i32>} : memref<1x2x32xf32, #tpu.memory_space<vmem>>, vector<1x2x32xf32>,
    %cst_44 = arith.constant dense<0.000000e+00> : vector<2x32xf32>
    %88 = tpu.matmul %83, %5, %cst_44 {dimension_numbers = #tpu.dot_dimension_numbers<[1], [0], [0], [1], [0, 0, 1, 1], [], []>} : vector<2x128xf32>, vector<128x32xf32>, vector<2x32xf32> -> vector<2x32xf32>
    %c0_45 = arith.constant 0 : index
    %c0_46 = arith.constant 0 : index
    %c0_47 = arith.constant 0 : index
    %89 = vector.load %arg34[%c0_45, %c0_46, %c0_47] : memref<1x2x32xf32, #tpu.memory_space<vmem>>, vector<1x2x32xf32>
    %90 = vector.shape_cast %89 : vector<1x2x32xf32> to vector<2x32xf32>
    %91 = vector.shape_cast %88 : vector<2x32xf32> to vector<1x2x32xf32>
    tpu.vector_store %arg34[%c0_45, %c0_46, %c0_47], %91 {strides = array<i32>} : memref<1x2x32xf32, #tpu.memory_space<vmem>>, vector<1x2x32xf32>,
    %cst_48 = arith.constant dense<0.000000e+00> : vector<2x32xf32>
    %92 = tpu.matmul %13, %5, %cst_48 {dimension_numbers = #tpu.dot_dimension_numbers<[1], [0], [0], [1], [0, 0, 1, 1], [], []>} : vector<2x128xf32>, vector<128x32xf32>, vector<2x32xf32> -> vector<2x32xf32>
    %cst_49 = arith.constant 2.500000e-01 : f32
    %93 = vector.broadcast %cst_49 : f32 to vector<2x32xf32>
    %94 = arith.mulf %92, %93 : vector<2x32xf32>
    %cst_50 = arith.constant dense<0.000000e+00> : vector<2x32xf32>
    %95 = tpu.matmul %15, %5, %cst_50 {dimension_numbers = #tpu.dot_dimension_numbers<[1], [0], [0], [1], [0, 0, 1, 1], [], []>} : vector<2x128xf32>, vector<128x32xf32>, vector<2x32xf32> -> vector<2x32xf32>
    %cst_51 = arith.constant 2.500000e-01 : f32
    %96 = vector.broadcast %cst_51 : f32 to vector<2x32xf32>
    %97 = arith.mulf %95, %96 : vector<2x32xf32>
    %98 = arith.sitofp %49 : vector<2x1xi32> to vector<2x1xf32>
    %cst_52 = arith.constant 6.250000e-02 : f32
    %99 = vector.broadcast %cst_52 : f32 to vector<2x1xf32>
    %100 = arith.mulf %98, %99 : vector<2x1xf32>
    %c0_53 = arith.constant 0 : index
    %c0_54 = arith.constant 0 : index
    %101 = vector.load %arg11[%c0_53, %c0_54] : memref<32x32xf32, #tpu.memory_space<vmem>>, vector<32x32xf32>
    %cst_55 = arith.constant dense<0.000000e+00> : vector<2x32xf32>
    %102 = tpu.matmul %94, %101, %cst_55 {dimension_numbers = #tpu.dot_dimension_numbers<[1], [0], [0], [1], [0, 0, 1, 1], [], []>} : vector<2x32xf32>, vector<32x32xf32>, vector<2x32xf32> -> vector<2x32xf32>
    %c0_56 = arith.constant 0 : index
    %c0_57 = arith.constant 0 : index
    %103 = vector.load %arg12[%c0_56, %c0_57] : memref<32x32xf32, #tpu.memory_space<vmem>>, vector<32x32xf32>
    %cst_58 = arith.constant dense<0.000000e+00> : vector<2x32xf32>
    %104 = tpu.matmul %97, %103, %cst_58 {dimension_numbers = #tpu.dot_dimension_numbers<[1], [0], [0], [1], [0, 0, 1, 1], [], []>} : vector<2x32xf32>, vector<32x32xf32>, vector<2x32xf32> -> vector<2x32xf32>
    %105 = arith.addf %102, %104 : vector<2x32xf32>
    %c0_59 = arith.constant 0 : index
    %c0_60 = arith.constant 0 : index
    %106 = vector.load %arg13[%c0_59, %c0_60] : memref<1x32xf32, #tpu.memory_space<vmem>>, vector<1x32xf32>
    %107 = vector.broadcast %74 : vector<2x1xf32> to vector<2x32xf32>
    %108 = vector.broadcast %106 : vector<1x32xf32> to vector<2x32xf32>
    %109 = arith.mulf %107, %108 : vector<2x32xf32>
    %110 = arith.addf %105, %109 : vector<2x32xf32>
    %c0_61 = arith.constant 0 : index
    %c0_62 = arith.constant 0 : index
    %111 = vector.load %arg14[%c0_61, %c0_62] : memref<1x32xf32, #tpu.memory_space<vmem>>, vector<1x32xf32>
    %112 = vector.broadcast %100 : vector<2x1xf32> to vector<2x32xf32>
    %113 = vector.broadcast %111 : vector<1x32xf32> to vector<2x32xf32>
    %114 = arith.mulf %112, %113 : vector<2x32xf32>
    %115 = arith.addf %110, %114 : vector<2x32xf32>
    %c0_63 = arith.constant 0 : index
    %c0_64 = arith.constant 0 : index
    %116 = vector.load %arg41[%c0_63, %c0_64] : memref<2x32xf32, #tpu.memory_space<vmem>>, vector<2x32xf32>
    %c0_65 = arith.constant 0 : index
    %c0_66 = arith.constant 0 : index
    %117 = vector.load %arg15[%c0_65, %c0_66] : memref<32x32xf32, #tpu.memory_space<vmem>>, vector<32x32xf32>
    %cst_67 = arith.constant dense<0.000000e+00> : vector<2x32xf32>
    %118 = tpu.matmul %116, %117, %cst_67 {dimension_numbers = #tpu.dot_dimension_numbers<[1], [0], [0], [1], [0, 0, 1, 1], [], []>} : vector<2x32xf32>, vector<32x32xf32>, vector<2x32xf32> -> vector<2x32xf32>
    %119 = arith.addf %115, %118 : vector<2x32xf32>
    %c0_68 = arith.constant 0 : index
    %c0_69 = arith.constant 0 : index
    %120 = vector.load %arg16[%c0_68, %c0_69] : memref<1x32xf32, #tpu.memory_space<vmem>>, vector<1x32xf32>
    %121 = vector.broadcast %120 : vector<1x32xf32> to vector<2x32xf32>
    %122 = arith.addf %119, %121 : vector<2x32xf32>
    %123 = math.tanh %122 : vector<2x32xf32>
    %c0_70 = arith.constant 0 : index
    %c0_71 = arith.constant 0 : index
    %124 = vector.load %arg17[%c0_70, %c0_71] : memref<32x32xf32, #tpu.memory_space<vmem>>, vector<32x32xf32>
    %cst_72 = arith.constant dense<0.000000e+00> : vector<2x32xf32>
    %125 = tpu.matmul %94, %124, %cst_72 {dimension_numbers = #tpu.dot_dimension_numbers<[1], [0], [0], [1], [0, 0, 1, 1], [], []>} : vector<2x32xf32>, vector<32x32xf32>, vector<2x32xf32> -> vector<2x32xf32>
    %c0_73 = arith.constant 0 : index
    %c0_74 = arith.constant 0 : index
    %126 = vector.load %arg18[%c0_73, %c0_74] : memref<32x32xf32, #tpu.memory_space<vmem>>, vector<32x32xf32>
    %cst_75 = arith.constant dense<0.000000e+00> : vector<2x32xf32>
    %127 = tpu.matmul %97, %126, %cst_75 {dimension_numbers = #tpu.dot_dimension_numbers<[1], [0], [0], [1], [0, 0, 1, 1], [], []>} : vector<2x32xf32>, vector<32x32xf32>, vector<2x32xf32> -> vector<2x32xf32>
    %128 = arith.addf %125, %127 : vector<2x32xf32>
    %c0_76 = arith.constant 0 : index
    %c0_77 = arith.constant 0 : index
    %129 = vector.load %arg19[%c0_76, %c0_77] : memref<1x32xf32, #tpu.memory_space<vmem>>, vector<1x32xf32>
    %130 = vector.broadcast %74 : vector<2x1xf32> to vector<2x32xf32>
    %131 = vector.broadcast %129 : vector<1x32xf32> to vector<2x32xf32>
    %132 = arith.mulf %130, %131 : vector<2x32xf32>
    %133 = arith.addf %128, %132 : vector<2x32xf32>
    %c0_78 = arith.constant 0 : index
    %c0_79 = arith.constant 0 : index
    %134 = vector.load %arg20[%c0_78, %c0_79] : memref<1x32xf32, #tpu.memory_space<vmem>>, vector<1x32xf32>
    %135 = vector.broadcast %100 : vector<2x1xf32> to vector<2x32xf32>
    %136 = vector.broadcast %134 : vector<1x32xf32> to vector<2x32xf32>
    %137 = arith.mulf %135, %136 : vector<2x32xf32>
    %138 = arith.addf %133, %137 : vector<2x32xf32>
    %c0_80 = arith.constant 0 : index
    %c0_81 = arith.constant 0 : index
    %139 = vector.load %arg42[%c0_80, %c0_81] : memref<2x32xf32, #tpu.memory_space<vmem>>, vector<2x32xf32>
    %c0_82 = arith.constant 0 : index
    %c0_83 = arith.constant 0 : index
    %140 = vector.load %arg21[%c0_82, %c0_83] : memref<32x32xf32, #tpu.memory_space<vmem>>, vector<32x32xf32>
    %cst_84 = arith.constant dense<0.000000e+00> : vector<2x32xf32>
    %141 = tpu.matmul %139, %140, %cst_84 {dimension_numbers = #tpu.dot_dimension_numbers<[1], [0], [0], [1], [0, 0, 1, 1], [], []>} : vector<2x32xf32>, vector<32x32xf32>, vector<2x32xf32> -> vector<2x32xf32>
    %142 = arith.addf %138, %141 : vector<2x32xf32>
    %c0_85 = arith.constant 0 : index
    %c0_86 = arith.constant 0 : index
    %143 = vector.load %arg22[%c0_85, %c0_86] : memref<1x32xf32, #tpu.memory_space<vmem>>, vector<1x32xf32>
    %144 = vector.broadcast %143 : vector<1x32xf32> to vector<2x32xf32>
    %145 = arith.addf %142, %144 : vector<2x32xf32>
    %146 = math.tanh %145 : vector<2x32xf32>
    %c0_87 = arith.constant 0 : index
    %c0_88 = arith.constant 0 : index
    %147 = vector.load %arg41[%c0_87, %c0_88] : memref<2x32xf32, #tpu.memory_space<vmem>>, vector<2x32xf32>
    tpu.vector_store %arg41[%c0_87, %c0_88], %123 {strides = array<i32>} : memref<2x32xf32, #tpu.memory_space<vmem>>, vector<2x32xf32>,
    %c0_89 = arith.constant 0 : index
    %c0_90 = arith.constant 0 : index
    %148 = vector.load %arg42[%c0_89, %c0_90] : memref<2x32xf32, #tpu.memory_space<vmem>>, vector<2x32xf32>
    tpu.vector_store %arg42[%c0_89, %c0_90], %146 {strides = array<i32>} : memref<2x32xf32, #tpu.memory_space<vmem>>, vector<2x32xf32>,
    %c0_91 = arith.constant 0 : index
    %c0_92 = arith.constant 0 : index
    %149 = vector.load %arg23[%c0_91, %c0_92] : memref<32x256xf32, #tpu.memory_space<vmem>>, vector<32x256xf32>
    %cst_93 = arith.constant dense<0.000000e+00> : vector<2x256xf32>
    %150 = tpu.matmul %123, %149, %cst_93 {dimension_numbers = #tpu.dot_dimension_numbers<[1], [0], [0], [1], [0, 0, 1, 1], [], []>} : vector<2x32xf32>, vector<32x256xf32>, vector<2x256xf32> -> vector<2x256xf32>
    %c0_94 = arith.constant 0 : index
    %c0_95 = arith.constant 0 : index
    %151 = vector.load %arg24[%c0_94, %c0_95] : memref<1x256xf32, #tpu.memory_space<vmem>>, vector<1x256xf32>
    %152 = vector.broadcast %151 : vector<1x256xf32> to vector<2x256xf32>
    %153 = arith.addf %150, %152 : vector<2x256xf32>
    %154 = vector.extract_strided_slice %153 {offsets = [0, 0], sizes = [2, 128], strides = [1, 1]} : vector<2x256xf32> to vector<2x128xf32>
    %c0_96 = arith.constant 0 : index
    %c0_97 = arith.constant 0 : index
    %155 = vector.load %arg39[%c0_96, %c0_97] : memref<2x128xf32, #tpu.memory_space<vmem>>, vector<2x128xf32>
    tpu.vector_store %arg39[%c0_96, %c0_97], %154 {strides = array<i32>} : memref<2x128xf32, #tpu.memory_space<vmem>>, vector<2x128xf32>,
    %156 = vector.extract_strided_slice %153 {offsets = [0, 128], sizes = [2, 128], strides = [1, 1]} : vector<2x256xf32> to vector<2x128xf32>
    %c0_98 = arith.constant 0 : index
    %c0_99 = arith.constant 0 : index
    %157 = vector.load %arg40[%c0_98, %c0_99] : memref<2x128xf32, #tpu.memory_space<vmem>>, vector<2x128xf32>
    tpu.vector_store %arg40[%c0_98, %c0_99], %156 {strides = array<i32>} : memref<2x128xf32, #tpu.memory_space<vmem>>, vector<2x128xf32>,
    %c0_100 = arith.constant 0 : index
    %c0_101 = arith.constant 0 : index
    %158 = vector.load %arg25[%c0_100, %c0_101] : memref<32x8xf32, #tpu.memory_space<vmem>>, vector<32x8xf32>
    %cst_102 = arith.constant dense<0.000000e+00> : vector<2x8xf32>
    %159 = tpu.matmul %146, %158, %cst_102 {dimension_numbers = #tpu.dot_dimension_numbers<[1], [0], [0], [1], [0, 0, 1, 1], [], []>} : vector<2x32xf32>, vector<32x8xf32>, vector<2x8xf32> -> vector<2x8xf32>
    %c0_103 = arith.constant 0 : index
    %c0_104 = arith.constant 0 : index
    %160 = vector.load %arg27[%c0_103, %c0_104] : memref<1x8xf32, #tpu.memory_space<vmem>>, vector<1x8xf32>
    %161 = vector.broadcast %160 : vector<1x8xf32> to vector<2x8xf32>
    %162 = arith.addf %159, %161 : vector<2x8xf32>
    %c0_105 = arith.constant 0 : index
    %c0_106 = arith.constant 0 : index
    %163 = vector.load %arg26[%c0_105, %c0_106] : memref<32x8xf32, #tpu.memory_space<vmem>>, vector<32x8xf32>
    %cst_107 = arith.constant dense<0.000000e+00> : vector<2x8xf32>
    %164 = tpu.matmul %146, %163, %cst_107 {dimension_numbers = #tpu.dot_dimension_numbers<[1], [0], [0], [1], [0, 0, 1, 1], [], []>} : vector<2x32xf32>, vector<32x8xf32>, vector<2x8xf32> -> vector<2x8xf32>
    %c0_108 = arith.constant 0 : index
    %c0_109 = arith.constant 0 : index
    %165 = vector.load %arg28[%c0_108, %c0_109] : memref<1x8xf32, #tpu.memory_space<vmem>>, vector<1x8xf32>
    %166 = vector.broadcast %165 : vector<1x8xf32> to vector<2x8xf32>
    %167 = arith.addf %164, %166 : vector<2x8xf32>
    %c0_110 = arith.constant 0 : index
    %c0_111 = arith.constant 0 : index
    %168 = vector.load %arg29[%c0_110, %c0_111] : memref<32x512xf32, #tpu.memory_space<vmem>>, vector<32x512xf32>
    %cst_112 = arith.constant dense<0.000000e+00> : vector<2x512xf32>
    %169 = tpu.matmul %146, %168, %cst_112 {dimension_numbers = #tpu.dot_dimension_numbers<[1], [0], [0], [1], [0, 0, 1, 1], [], []>} : vector<2x32xf32>, vector<32x512xf32>, vector<2x512xf32> -> vector<2x512xf32>
    %c0_113 = arith.constant 0 : index
    %c0_114 = arith.constant 0 : index
    %170 = vector.load %arg30[%c0_113, %c0_114] : memref<1x512xf32, #tpu.memory_space<vmem>>, vector<1x512xf32>
    %171 = vector.broadcast %170 : vector<1x512xf32> to vector<2x512xf32>
    %172 = arith.addf %169, %171 : vector<2x512xf32>
    %173 = vector.extract_strided_slice %172 {offsets = [0, 0], sizes = [2, 256], strides = [1, 1]} : vector<2x512xf32> to vector<2x256xf32>
    %174 = vector.extract_strided_slice %172 {offsets = [0, 256], sizes = [2, 256], strides = [1, 1]} : vector<2x512xf32> to vector<2x256xf32>
    %c0_115 = arith.constant 0 : index
    %c0_116 = arith.constant 0 : index
    %175 = vector.load %arg9[%c0_115, %c0_116] : memref<256x32xf32, #tpu.memory_space<vmem>>, vector<256x32xf32>
    %c0_117 = arith.constant 0 : index
    %c0_118 = arith.constant 0 : index
    %176 = vector.load %arg10[%c0_117, %c0_118] : memref<8x256xf32, #tpu.memory_space<vmem>>, vector<8x256xf32>
    %177 = arith.mulf %173, %173 : vector<2x256xf32>
    %178 = arith.mulf %174, %174 : vector<2x256xf32>
    %179 = arith.addf %177, %178 : vector<2x256xf32>
    %cst_119 = arith.constant dense<0.000000e+00> : vector<2x32xf32>
    %180 = tpu.matmul %179, %175, %cst_119 {dimension_numbers = #tpu.dot_dimension_numbers<[1], [0], [0], [1], [0, 0, 1, 1], [], []>} : vector<2x256xf32>, vector<256x32xf32>, vector<2x32xf32> -> vector<2x32xf32>
    %181 = math.rsqrt %180 : vector<2x32xf32>
    %cst_120 = arith.constant dense<0.000000e+00> : vector<2x256xf32>
    %182 = tpu.matmul %162, %176, %cst_120 {dimension_numbers = #tpu.dot_dimension_numbers<[1], [0], [0], [1], [0, 0, 1, 1], [], []>} : vector<2x8xf32>, vector<8x256xf32>, vector<2x256xf32> -> vector<2x256xf32>
    %cst_121 = arith.constant dense<0.000000e+00> : vector<2x256xf32>
    %183 = tpu.matmul %167, %176, %cst_121 {dimension_numbers = #tpu.dot_dimension_numbers<[1], [0], [0], [1], [0, 0, 1, 1], [], []>} : vector<2x8xf32>, vector<8x256xf32>, vector<2x256xf32> -> vector<2x256xf32>
    %184 = arith.mulf %173, %182 : vector<2x256xf32>
    %185 = arith.mulf %174, %183 : vector<2x256xf32>
    %186 = arith.subf %184, %185 : vector<2x256xf32>
    %cst_122 = arith.constant dense<0.000000e+00> : vector<2x32xf32>
    %187 = tpu.matmul %186, %175, %cst_122 {dimension_numbers = #tpu.dot_dimension_numbers<[1], [0], [0], [1], [0, 0, 1, 1], [], []>} : vector<2x256xf32>, vector<256x32xf32>, vector<2x32xf32> -> vector<2x32xf32>
    %188 = arith.mulf %187, %181 : vector<2x32xf32>
    %c0_123 = arith.constant 0 : index
    %c0_124 = arith.constant 0 : index
    %c0_125 = arith.constant 0 : index
    %189 = vector.load %arg35[%c0_123, %c0_124, %c0_125] : memref<1x2x32xf32, #tpu.memory_space<vmem>>, vector<1x2x32xf32>
    %190 = vector.shape_cast %189 : vector<1x2x32xf32> to vector<2x32xf32>
    %191 = vector.shape_cast %188 : vector<2x32xf32> to vector<1x2x32xf32>
    tpu.vector_store %arg35[%c0_123, %c0_124, %c0_125], %191 {strides = array<i32>} : memref<1x2x32xf32, #tpu.memory_space<vmem>>, vector<1x2x32xf32>,
    %192 = arith.mulf %173, %183 : vector<2x256xf32>
    %193 = arith.mulf %174, %182 : vector<2x256xf32>
    %194 = arith.addf %192, %193 : vector<2x256xf32>
    %cst_126 = arith.constant dense<0.000000e+00> : vector<2x32xf32>
    %195 = tpu.matmul %194, %175, %cst_126 {dimension_numbers = #tpu.dot_dimension_numbers<[1], [0], [0], [1], [0, 0, 1, 1], [], []>} : vector<2x256xf32>, vector<256x32xf32>, vector<2x32xf32> -> vector<2x32xf32>
    %196 = arith.mulf %195, %181 : vector<2x32xf32>
    %c0_127 = arith.constant 0 : index
    %c0_128 = arith.constant 0 : index
    %c0_129 = arith.constant 0 : index
    %197 = vector.load %arg36[%c0_127, %c0_128, %c0_129] : memref<1x2x32xf32, #tpu.memory_space<vmem>>, vector<1x2x32xf32>
    %198 = vector.shape_cast %197 : vector<1x2x32xf32> to vector<2x32xf32>
    %199 = vector.shape_cast %196 : vector<2x32xf32> to vector<1x2x32xf32>
    tpu.vector_store %arg36[%c0_127, %c0_128, %c0_129], %199 {strides = array<i32>} : memref<1x2x32xf32, #tpu.memory_space<vmem>>, vector<1x2x32xf32>,
    return
  }
  func.func @transform_0(%arg0: i32) -> (i32, i32) {
    %c0_i32 = arith.constant 0 : i32
    %c0_i32_0 = arith.constant 0 : i32
    %c0_i32_1 = arith.constant 0 : i32
    return %c0_i32, %c0_i32_0 : i32, i32
  }
  func.func @transform_1(%arg0: i32) -> (i32, i32) {
    %c0_i32 = arith.constant 0 : i32
    %c0_i32_0 = arith.constant 0 : i32
    %c0_i32_1 = arith.constant 0 : i32
    return %c0_i32, %c0_i32_0 : i32, i32
  }
  func.func @transform_2(%arg0: i32) -> (i32, i32) {
    %c0_i32 = arith.constant 0 : i32
    %c0_i32_0 = arith.constant 0 : i32
    %c0_i32_1 = arith.constant 0 : i32
    return %c0_i32, %c0_i32_0 : i32, i32
  }
  func.func @transform_3(%arg0: i32) -> (i32, i32) {
    %c0_i32 = arith.constant 0 : i32
    %c0_i32_0 = arith.constant 0 : i32
    %c0_i32_1 = arith.constant 0 : i32
    return %c0_i32, %c0_i32_0 : i32, i32
  }
  func.func @transform_4(%arg0: i32) -> (i32, i32) {
    %c0_i32 = arith.constant 0 : i32
    %c0_i32_0 = arith.constant 0 : i32
    %c0_i32_1 = arith.constant 0 : i32
    return %c0_i32, %c0_i32_0 : i32, i32
  }
  func.func @transform_5(%arg0: i32) -> (i32, i32) {
    %c0_i32 = arith.constant 0 : i32
    %c0_i32_0 = arith.constant 0 : i32
    %c0_i32_1 = arith.constant 0 : i32
    return %c0_i32, %c0_i32_0 : i32, i32
  }
  func.func @transform_6(%arg0: i32) -> (i32, i32) {
    %c0_i32 = arith.constant 0 : i32
    %c0_i32_0 = arith.constant 0 : i32
    %c0_i32_1 = arith.constant 0 : i32
    return %c0_i32, %c0_i32_0 : i32, i32
  }
  func.func @transform_7(%arg0: i32) -> (i32, i32) {
    %c0_i32 = arith.constant 0 : i32
    %c0_i32_0 = arith.constant 0 : i32
    %c0_i32_1 = arith.constant 0 : i32
    return %c0_i32, %c0_i32_0 : i32, i32
  }
  func.func @transform_8(%arg0: i32) -> (i32, i32) {
    %c0_i32 = arith.constant 0 : i32
    %c0_i32_0 = arith.constant 0 : i32
    %c0_i32_1 = arith.constant 0 : i32
    return %c0_i32, %c0_i32_0 : i32, i32
  }
  func.func @transform_9(%arg0: i32) -> (i32, i32) {
    %c0_i32 = arith.constant 0 : i32
    %c0_i32_0 = arith.constant 0 : i32
    %c0_i32_1 = arith.constant 0 : i32
    return %c0_i32, %c0_i32_0 : i32, i32
  }
  func.func @transform_10(%arg0: i32) -> (i32, i32) {
    %c0_i32 = arith.constant 0 : i32
    %c0_i32_0 = arith.constant 0 : i32
    %c0_i32_1 = arith.constant 0 : i32
    return %c0_i32, %c0_i32_0 : i32, i32
  }
  func.func @transform_11(%arg0: i32) -> (i32, i32) {
    %c0_i32 = arith.constant 0 : i32
    %c0_i32_0 = arith.constant 0 : i32
    %c0_i32_1 = arith.constant 0 : i32
    return %c0_i32, %c0_i32_0 : i32, i32
  }
  func.func @transform_12(%arg0: i32) -> (i32, i32) {
    %c0_i32 = arith.constant 0 : i32
    %c0_i32_0 = arith.constant 0 : i32
    %c0_i32_1 = arith.constant 0 : i32
    return %c0_i32, %c0_i32_0 : i32, i32
  }
  func.func @transform_13(%arg0: i32) -> (i32, i32) {
    %c0_i32 = arith.constant 0 : i32
    %c0_i32_0 = arith.constant 0 : i32
    %c0_i32_1 = arith.constant 0 : i32
    return %c0_i32, %c0_i32_0 : i32, i32
  }
  func.func @transform_14(%arg0: i32) -> (i32, i32) {
    %c0_i32 = arith.constant 0 : i32
    %c0_i32_0 = arith.constant 0 : i32
    %c0_i32_1 = arith.constant 0 : i32
    return %c0_i32, %c0_i32_0 : i32, i32
  }
  func.func @transform_15(%arg0: i32) -> (i32, i32) {
    %c0_i32 = arith.constant 0 : i32
    %c0_i32_0 = arith.constant 0 : i32
    %c0_i32_1 = arith.constant 0 : i32
    return %c0_i32, %c0_i32_0 : i32, i32
  }
  func.func @transform_16(%arg0: i32) -> (i32, i32) {
    %c0_i32 = arith.constant 0 : i32
    %c0_i32_0 = arith.constant 0 : i32
    %c0_i32_1 = arith.constant 0 : i32
    return %c0_i32, %c0_i32_0 : i32, i32
  }
  func.func @transform_17(%arg0: i32) -> (i32, i32) {
    %c0_i32 = arith.constant 0 : i32
    %c0_i32_0 = arith.constant 0 : i32
    %c0_i32_1 = arith.constant 0 : i32
    return %c0_i32, %c0_i32_0 : i32, i32
  }
  func.func @transform_18(%arg0: i32) -> (i32, i32) {
    %c0_i32 = arith.constant 0 : i32
    %c0_i32_0 = arith.constant 0 : i32
    %c0_i32_1 = arith.constant 0 : i32
    return %c0_i32, %c0_i32_0 : i32, i32
  }
  func.func @transform_19(%arg0: i32) -> (i32, i32) {
    %c0_i32 = arith.constant 0 : i32
    %c0_i32_0 = arith.constant 0 : i32
    %c0_i32_1 = arith.constant 0 : i32
    return %c0_i32, %c0_i32_0 : i32, i32
  }
  func.func @transform_20(%arg0: i32) -> (i32, i32) {
    %c0_i32 = arith.constant 0 : i32
    %c0_i32_0 = arith.constant 0 : i32
    %c0_i32_1 = arith.constant 0 : i32
    return %c0_i32, %c0_i32_0 : i32, i32
  }
  func.func @transform_21(%arg0: i32) -> (i32, i32) {
    %c0_i32 = arith.constant 0 : i32
    %c0_i32_0 = arith.constant 0 : i32
    %c0_i32_1 = arith.constant 0 : i32
    return %c0_i32, %c0_i32_0 : i32, i32
  }
  func.func @transform_22(%arg0: i32) -> (i32, i32) {
    %c0_i32 = arith.constant 0 : i32
    %c0_i32_0 = arith.constant 0 : i32
    %c0_i32_1 = arith.constant 0 : i32
    return %c0_i32, %c0_i32_0 : i32, i32
  }
  func.func @transform_23(%arg0: i32) -> (i32, i32) {
    %c0_i32 = arith.constant 0 : i32
    %c0_i32_0 = arith.constant 0 : i32
    %c0_i32_1 = arith.constant 0 : i32
    return %c0_i32, %c0_i32_0 : i32, i32
  }
  func.func @transform_24(%arg0: i32) -> (i32, i32) {
    %c0_i32 = arith.constant 0 : i32
    %c0_i32_0 = arith.constant 0 : i32
    %c0_i32_1 = arith.constant 0 : i32
    return %c0_i32, %c0_i32_0 : i32, i32
  }
  func.func @transform_25(%arg0: i32) -> (i32, i32) {
    %c0_i32 = arith.constant 0 : i32
    %c0_i32_0 = arith.constant 0 : i32
    %c0_i32_1 = arith.constant 0 : i32
    return %c0_i32, %c0_i32_0 : i32, i32
  }
  func.func @transform_26(%arg0: i32) -> (i32, i32) {
    %c0_i32 = arith.constant 0 : i32
    %c0_i32_0 = arith.constant 0 : i32
    %c0_i32_1 = arith.constant 0 : i32
    return %c0_i32, %c0_i32_0 : i32, i32
  }
  func.func @transform_27(%arg0: i32) -> (i32, i32) {
    %c0_i32 = arith.constant 0 : i32
    %c0_i32_0 = arith.constant 0 : i32
    %c0_i32_1 = arith.constant 0 : i32
    return %c0_i32, %c0_i32_0 : i32, i32
  }
  func.func @transform_28(%arg0: i32) -> (i32, i32) {
    %c0_i32 = arith.constant 0 : i32
    %c0_i32_0 = arith.constant 0 : i32
    %c0_i32_1 = arith.constant 0 : i32
    return %c0_i32, %c0_i32_0 : i32, i32
  }
  func.func @transform_29(%arg0: i32) -> (i32, i32) {
    %c0_i32 = arith.constant 0 : i32
    %c0_i32_0 = arith.constant 0 : i32
    %c0_i32_1 = arith.constant 0 : i32
    return %c0_i32, %c0_i32_0 : i32, i32
  }
  func.func @transform_30(%arg0: i32) -> (i32, i32, i32) {
    %c0_i32 = arith.constant 0 : i32
    %c0_i32_0 = arith.constant 0 : i32
    %c0_i32_1 = arith.constant 0 : i32
    return %arg0, %c0_i32, %c0_i32_0 : i32, i32, i32
  }
  func.func @transform_31(%arg0: i32) -> (i32, i32, i32) {
    %c0_i32 = arith.constant 0 : i32
    %c0_i32_0 = arith.constant 0 : i32
    %c0_i32_1 = arith.constant 0 : i32
    return %arg0, %c0_i32, %c0_i32_0 : i32, i32, i32
  }
  func.func @transform_32(%arg0: i32) -> (i32, i32, i32) {
    %c0_i32 = arith.constant 0 : i32
    %c0_i32_0 = arith.constant 0 : i32
    %c0_i32_1 = arith.constant 0 : i32
    return %arg0, %c0_i32, %c0_i32_0 : i32, i32, i32
  }
  func.func @transform_33(%arg0: i32) -> (i32, i32, i32) {
    %c0_i32 = arith.constant 0 : i32
    %c0_i32_0 = arith.constant 0 : i32
    %c0_i32_1 = arith.constant 0 : i32
    return %arg0, %c0_i32, %c0_i32_0 : i32, i32, i32
  }
  func.func @transform_34(%arg0: i32) -> (i32, i32, i32) {
    %c0_i32 = arith.constant 0 : i32
    %c0_i32_0 = arith.constant 0 : i32
    %c0_i32_1 = arith.constant 0 : i32
    return %arg0, %c0_i32, %c0_i32_0 : i32, i32, i32
  }
  func.func @transform_35(%arg0: i32) -> (i32, i32, i32) {
    %c0_i32 = arith.constant 0 : i32
    %c0_i32_0 = arith.constant 0 : i32
    %c0_i32_1 = arith.constant 0 : i32
    return %arg0, %c0_i32, %c0_i32_0 : i32, i32, i32
  }
  func.func @transform_36(%arg0: i32) -> (i32, i32, i32) {
    %c0_i32 = arith.constant 0 : i32
    %c0_i32_0 = arith.constant 0 : i32
    %c0_i32_1 = arith.constant 0 : i32
    return %arg0, %c0_i32, %c0_i32_0 : i32, i32, i32
  }
  func.func @transform_37(%arg0: i32) -> (i32, i32, i32) {
    %c0_i32 = arith.constant 0 : i32
    %c0_i32_0 = arith.constant 0 : i32
    %c0_i32_1 = arith.constant 0 : i32
    return %arg0, %c0_i32, %c0_i32_0 : i32, i32, i32
  }
}

</mosaic_0001>

<bundles_post_ra>
// kernel: tpu_custom_call.1
= control target key start
LH: loop header
LB: loop body
LE: loop exit
PB: predicated region body
PF: predicated region fallthrough
CT: control target
= control target key end

     0   :  { %s4841_s6 = smov 1   ;;  %s4842_s10 = smov 2   ;;  %s6169_s0 = inlined_call_operand.smem [shape: u32[38], index: -1, kind: input, shape index: {}] }
   0x1   :  { %s4895_s5 = sld [smem:[%s6169_s0]]   ;;  %s4843_s14 = smov 3  }
   0x2   :  { %s4900_s9 = sld [smem:[%s6169_s0 + %s4841_s6]]   ;;  %s4844_s18 = smov 4  }
   0x3   :  { %s4905_s13 = sld [smem:[%s6169_s0 + %s4842_s10]]   ;;  %s4845_s22 = smov 5  }
   0x4   :  { %s4910_s17 = sld [smem:[%s6169_s0 + %s4843_s14]]   ;;  %s4846_s26 = smov 6  }
   0x5   :  { %s4915_s21 = sld [smem:[%s6169_s0 + %s4844_s18]]   ;;  %s4847_s30 = smov 7  }
   0x6   :  { %s4920_s25 = sld [smem:[%s6169_s0 + %s4845_s22]]   ;;  %s4848_s4 = smov 8  }
   0x7   :  { %6205 = sst [smem:[#allocation20_spill]] %s4895_s5  ;;  %s4849_s10 = smov 9  }
   0x8   :  { %6206 = sst [smem:[#allocation21_spill]] %s4900_s9  ;;  %s4850_s15 = smov 10  }
   0x9   :  { %6207 = sst [smem:[#allocation22_spill]] %s4905_s13  ;;  %s4851_s20 = smov 11  }
   0xa   :  { %6208 = sst [smem:[#allocation23_spill]] %s4910_s17  ;;  %s4853_s1 = smov 13  }
   0xb   :  { %s4925_s29 = sld [smem:[%s6169_s0 + %s4846_s26]]   ;;  %s4852_s26 = smov 12  }
   0xc   :  { %s4930_s3 = sld [smem:[%s6169_s0 + %s4847_s30]]   ;;  %s4854_s7 = smov 14  }
   0xd   :  { %s4935_s8 = sld [smem:[%s6169_s0 + %s4848_s4]]   ;;  %s4856_s22 = smov 16  }
   0xe   :  { %s4940_s14 = sld [smem:[%s6169_s0 + %s4849_s10]]   ;;  %s4857_s28 = smov 17  }
   0xf   :  { %s4945_s19 = sld [smem:[%s6169_s0 + %s4850_s15]]   ;;  %s4855_s15 = smov 15  }
  0x10   :  { %s4950_s24 = sld [smem:[%s6169_s0 + %s4851_s20]]  }
  0x11   :  { %s4955_s30 = sld [smem:[%s6169_s0 + %s4852_s26]]  }
  0x12   :  { %6209 = sst [smem:[#allocation24_spill]] %s4930_s3 }
  0x13   :  { %6210 = sst [smem:[#allocation25_spill]] %s4935_s8 }
  0x14   :  { %6211 = sst [smem:[#allocation26_spill]] %s4940_s14 }
  0x15   :  { %6212 = sst [smem:[#allocation27_spill]] %s4945_s19 }
  0x16   :  { %s4960_s6 = sld [smem:[%s6169_s0 + %s4853_s1]]  }
  0x17   :  { %6213 = sst [smem:[#allocation28_spill]] %s4955_s30 }
  0x18   :  { %s4965_s12 = sld [smem:[%s6169_s0 + %s4854_s7]]   ;;  %s4858_s7 = smov 18  }
  0x19   :  { %s4970_s20 = sld [smem:[%s6169_s0 + %s4855_s15]]   ;;  %s4859_s15 = smov 19  }
  0x1a   :  { %s4975_s27 = sld [smem:[%s6169_s0 + %s4856_s22]]   ;;  %s4860_s22 = smov 20  }
  0x1b   :  { %s4980_s4 = sld [smem:[%s6169_s0 + %s4857_s28]]   ;;  %s4861_s28 = smov 21  }
  0x1c   :  { %6214 = sst [smem:[#allocation29_spill]] %s4960_s6 }
  0x1d   :  { %s4985_s14 = sld [smem:[%s6169_s0 + %s4858_s7]]   ;;  %s4862_s7 = smov 22  }
  0x1e   :  { %6215 = sst [smem:[#allocation30_spill]] %s4965_s12 }
  0x1f   :  { %6216 = sst [smem:[#allocation31_spill]] %s4970_s20 }
  0x20   :  { %s4990_s8 = sld [smem:[%s6169_s0 + %s4859_s15]]   ;;  %s4863_s15 = smov 23  }
  0x21   :  { %6217 = sst [smem:[#allocation32_spill]] %s4980_s4 }
  0x22   :  { %s4995_s20 = sld [smem:[%s6169_s0 + %s4860_s22]]   ;;  %s4864_s22 = smov 24  }
  0x23   :  { %6218 = sst [smem:[#allocation33_spill]] %s4985_s14 }
  0x24   :  { %s5000_s6 = sld [smem:[%s6169_s0 + %s4861_s28]]   ;;  %s4865_s28 = smov 25  }
  0x25   :  { %s5005_s14 = sld [smem:[%s6169_s0 + %s4862_s7]]   ;;  %s4866_s7 = smov 26  }
  0x26   :  { %6219 = sst [smem:[#allocation34_spill]] %s4990_s8 }
  0x27   :  { %s5010_s8 = sld [smem:[%s6169_s0 + %s4863_s15]]   ;;  %s4867_s15 = smov 27  }
  0x28   :  { %s5015_s30 = sld [smem:[%s6169_s0 + %s4864_s22]]   ;;  %s4868_s22 = smov 28  }
  0x2a   :  { %6220 = sst [smem:[#allocation35_spill]] %s5000_s6 }
  0x2b   :  { %6221 = sst [smem:[#allocation36_spill]] %s5005_s14 }
  0x2c   :  { %s5020_s6 = sld [smem:[%s6169_s0 + %s4865_s28]]   ;;  %s4869_s28 = smov 29  }
  0x2d   :  { %6222 = sst [smem:[#allocation37_spill]] %s5010_s8 }
  0x2e   :  { %6223 = sst [smem:[#allocation38_spill]] %s5015_s30 }
  0x2f   :  { %s5025_s14 = sld [smem:[%s6169_s0 + %s4866_s7]]   ;;  %s4870_s7 = smov 30  }
  0x30   :  { %s5030_s8 = sld [smem:[%s6169_s0 + %s4867_s15]]   ;;  %s4871_s15 = smov 31  }
  0x31   :  { %s5035_s30 = sld [smem:[%s6169_s0 + %s4868_s22]]   ;;  %s4872_s22 = smov 32  }
  0x32   :  { %6224 = sst [smem:[#allocation39_spill]] %s5020_s6 }
  0x33   :  { %s5040_s6 = sld [smem:[%s6169_s0 + %s4869_s28]]   ;;  %s4873_s28 = smov 33  }
  0x35   :  { %6225 = sst [smem:[#allocation40_spill]] %s5025_s14 }
  0x36   :  { %6226 = sst [smem:[#allocation41_spill]] %s5030_s8 }
  0x37   :  { %6227 = sst [smem:[#allocation42_spill]] %s5035_s30 }
  0x38   :  { %s5045_s14 = sld [smem:[%s6169_s0 + %s4870_s7]]   ;;  %s4874_s7 = smov 34  }
  0x39   :  { %6228 = sst [smem:[#allocation43_spill]] %s5040_s6 }
  0x3a   :  { %s5050_s8 = sld [smem:[%s6169_s0 + %s4871_s15]]   ;;  %s4875_s15 = smov 35  }
  0x3b   :  { %s5055_s30 = sld [smem:[%s6169_s0 + %s4872_s22]]   ;;  %s4876_s22 = smov 36  }
  0x3c   :  { %s5060_s6 = sld [smem:[%s6169_s0 + %s4873_s28]]   ;;  %s4877_s28 = smov 37  }
  0x3e   :  { %6229 = sst [smem:[#allocation44_spill]] %s5045_s14 }
  0x3f   :  { %s5065_s14 = sld [smem:[%s6169_s0 + %s4874_s7]]  }
  0x40   :  { %6230 = sst [smem:[#allocation45_spill]] %s5050_s8 }
  0x41   :  { %6231 = sst [smem:[#allocation46_spill]] %s5055_s30 }
  0x42   :  { %6232 = sst [smem:[#allocation47_spill]] %s5060_s6 }
  0x43   :  { %s5070_s8 = sld [smem:[%s6169_s0 + %s4875_s15]]  }
  0x44   :  { %s5075_s30 = sld [smem:[%s6169_s0 + %s4876_s22]]  }
  0x45   :  { %s5080_s6 = sld [smem:[%s6169_s0 + %s4877_s28]]  }
  0x49   :  { %6233 = sst [smem:[#allocation48_spill]] %s5070_s8 }
  0x4b   :  { %6234 = sst [smem:[#allocation49_spill]] %s5080_s6 }
  0x4c   :  { %81 = vsyncpa [#allocation7], 0 }
  0x4d   :  { %83 = vsyncpa [#allocation7 + $0x1], 0 }
  0x4e   :  { %84 = vsyncpa [#allocation9], 0 }
  0x4f   :  { %86 = vsyncpa [#allocation9 + $0x1], 0 }
  0x50   :  { %87 = vsyncpa [#allocation12], 0 }
  0x51   :  { %89 = vsyncpa [#allocation12 + $0x1], 0 }
  0x52   :  { %90 = vsyncpa [#allocation15], 0 }
  0x53   :  { %92 = vsyncpa [#allocation15 + $0x1], 0  ;;  %s5082_s7 = smov 0   ;;  %s5084_s10 = smov 0  }
  0x54   :  { %s5086_s11 = smov 0   ;;  %s5088_s15 = smov 0  }
  0x55 LB: > { %s6235_s19 = sld [smem:[#allocation27_spill]]  ;;  %s5103_s0 = sadd.s32 4294967295, %s4839_s15   ;;  %s4827_s7 = sphi %s5082_s7, %s6292_s7   ;;  %s4839_s15 = sphi %s5088_s15, %s6291_s15   ;;  %s4835_s11 = sphi %s5086_s11, %s6294_s11   ;;  %s4831_s10 = sphi %s5084_s10, %s6293_s10  }
  0x56   : > { %s6236_s17 = sld [smem:[#allocation23_spill]]  ;;  %s6180_s16 = sadd.s32 4294967294, %s4839_s15  }
  0x57   : > { %s6237_s12 = sld [smem:[#allocation30_spill]]  ;;  %s5107_s18 = sadd.s32 1, %s4839_s15  }
  0x58   : > { %s6238_s4 = sld [smem:[#allocation32_spill]]  ;;  %s735_s22 = sadd.s32 1, %s4835_s11 }
  0x59   : > { %s6239_s3 = sld [smem:[#allocation24_spill]]  ;;  %s732_s23 = ssub.s32 %s4839_s15, %s5107_s18 }
  0x5a   : > { %6240 = sst [smem:[#allocation50_spill]] %s4827_s7  ;;  %p745_p0 = scmp.ne.s32.totalorder %s4835_s11, %s4831_s10 }
  0x5b   : > { %6241 = sst [smem:[#allocation51_spill]] %s4831_s10  ;;  %p733_p1 = scmp.eq.s32.totalorder %s732_s23, 0 }
  0x5c   : > { %6242 = sst [smem:[#allocation52_spill]] %s4835_s11  ;;  %p746_p2 = scmp.eq.s32.totalorder %s5103_s0, 2 }
  0x5d   : > { %6243 = sst [smem:[#allocation53_spill]] %s4839_s15  ;;  %p751_p3 = scmp.ne.s32.totalorder %s4831_s10, %s4827_s7 }
  0x5e   : > { %6244 = sst [smem:[#allocation54_spill]] %s5107_s18  ;;  %p752_p4 = scmp.eq.s32.totalorder %s6180_s16, 2 }
  0x5f   : > { %s5120_s26 = scalar_select %p733_p1, %s4835_s11, %s735_s22  }
  0x60   : > { %p5122_p5 = por %p746_p2, %p745_p0  ;;  %p5126_p6 = por %p752_p4, %p751_p3 }
  0x61   : > { %6245 = sst [smem:[#allocation55_spill]] %s5120_s26  ;;  %p3806_p7 = scmp.ge.s32.totalorder %s4839_s15, 1 }
  0x62   : > { %s6247_s1 = scalar_select %p5126_p6, 1, 0 }
  0x63   : > { %p1042_p8 = scmp.lt.s32.totalorder %s4839_s15, 4 }
  0x64   : > { %6248 = sst [smem:[#allocation56_spill]] %s6247_s1 }
  0x65   : > { %p1043_p9 = pnand %p3806_p7, %p1042_p8 }
  0x66   : > { %s6249_s6 = sld [smem:[#allocation49_spill]] (!%p1043_p9)  ;;  %s5133_s2 = sand.u32 (!%p1043_p9), 1, %s4831_s10  }
  0x67   : > { %1046 = sbr.rel (%p1043_p9) target bundleno = 2250 (0x8ca), region = 140  ;;  %s5136_s22 = sshll.u32 (!%p1043_p9), %s5133_s2, 1 }
  0x68   : > { %p1162_p10 = scmp.lt.s32.totalorder (!%p1043_p9), %s5103_s0, 2  ;;  %s6191_s18 = scalar_lea.vmem (!%p1043_p9), [#allocation6], %s5136_s22 }
  0x69   : > { %s6193_s1 = scalar_lea.vmem (!%p1043_p9), [#allocation8], %s5136_s22  ;;  %s6190_s10 = scalar_lea.vmem (!%p1043_p9), [#allocation10], %s5136_s22 }
  0x6a   : > { %s6192_s7 = scalar_lea.vmem (!%p1043_p9), [#allocation11], %s5136_s22  ;;  %p3815_p11 = scmp.ne.s32.totalorder (!%p1043_p9), %s5103_s0, 0 }
  0x6c   : > { %s1163_s23 = scalar_select %p1162_p10, %s5103_s0, 2 }
  0x6d   : > { %1173 = sbr.rel (%p3815_p11) target bundleno = 117 (0x75), region = 144  ;;  %s6250_s13 = sld [smem:[#allocation22_spill]] (!%p3815_p11) }
  0x6e   : > { %s3813_s16 = sshll.u32 %s1163_s23, 1 }
  0x6f   : > { %s5141_s26 = scalar_lea.vmem %s5075_s30, %s3813_s16  ;;  %s5144_s11 = scalar_lea.vmem %s6249_s6, %s3813_s16 }
  0x72   : > { %vm1177_vm0 = vcmask 254976   ;;  %v4878_v1 = vmov 0.0  }
  0x73   : > { %v1174_v0 = vld [vmem:[%s6250_s13] sm:$0x3]  ;;  %1176 = vst [vmem:[#allocation3] sm:$0x3] %v4878_v1  ;;  %1178 = vst.msk [vmem:[#allocation4] sm:$0x3] %vm1177_vm0, %v4878_v1 }
  0x74   : > { %1175 = vst [vmem:[#allocation2] sm:$0x3] %v1174_v0  ;;  %1179 = vst.msk [vmem:[#allocation5] sm:$0x3] %vm1177_vm0, %v4878_v1 }
  0x75 PF: > { %v4879_v6 = vmov 0.0   ;;  %v5165_v7 = vld [vmem:[%s6236_s17 + $0x78] sm:$0xff]  ;;  %v5171_v9 = vld [vmem:[%s6236_s17 + $0x70] sm:$0xff]  ;;  %vm1201_vm1 = vcmask 1041408   ;;  %v5181_v12 = vld [vmem:[%s6236_s17 + $0x68] sm:$0xff]  ;;  %s6251_s5 = sld [smem:[#allocation20_spill]] }
  0x76   : > { %4141 = vmatprep.subr.mxu0 %v4879_v6  ;;  %4176 = vmatprep.subr.mxu1 %v4879_v6  ;;  %v5168_v8 = vld [vmem:[%s4915_s21 + $0x78] sm:$0xff]  ;;  %v5176_v10 = vld [vmem:[%s4915_s21 + $0x70] sm:$0xff]  ;;  %v5186_v13 = vld [vmem:[%s4915_s21 + $0x68] sm:$0xff]  ;;  %s6252_s9 = sld [smem:[#allocation21_spill]]  ;;  %vm4880_vm2 = vmmov 0   ;;  %vm1536_vm3 = vcmask 123904  }
  0x77   : > { %4142 = vmatpush3.msra.mxu0 %v5165_v7  ;;  %4177 = vmatpush3.msra.mxu1 %v5168_v8  ;;  %v5192_v15 = vld [vmem:[%s6236_s17 + $0x60] sm:$0xff]  ;;  %v5201_v17 = vld [vmem:[%s6236_s17 + $0x58] sm:$0xff]  ;;  %v5211_v19 = vld [vmem:[%s6236_s17 + $0x50] sm:$0xff]  ;;  %vm1557_vm6 = vcmask 1024   ;;  %vm1564_vm7 = vcmask 130048   ;;  %vm1809_vm11 = vcmask 254976  }
  0x78   : > { %4143 = vmatprep.subr.mxu0 %v4879_v6  ;;  %4178 = vmatprep.subr.mxu1 %v4879_v6  ;;  %v5196_v16 = vld [vmem:[%s4915_s21 + $0x60] sm:$0xff]  ;;  %v5206_v18 = vld [vmem:[%s4915_s21 + $0x58] sm:$0xff]  ;;  %v5216_v20 = vld [vmem:[%s4915_s21 + $0x50] sm:$0xff]  ;;  %vm2034_vm12 = vcmask 261120   ;;  %s6256_s23 = sld [smem:[#allocation42_spill]]  ;;  %vm3095_vm13 = vcmask 64512  }
  0x79   : > { %4144 = vmatpush3.msra.mxu0 %v5171_v9  ;;  %4179 = vmatpush3.msra.mxu1 %v5176_v10  ;;  %v5226_v21 = vld [vmem:[%s6236_s17 + $0x48] sm:$0xff]  ;;  %v5236_v23 = vld [vmem:[%s6236_s17 + $0x40] sm:$0xff]  ;;  %v5246_v25 = vld [vmem:[%s6236_s17 + $0x38] sm:$0xff]  ;;  %s6258_s8 = sld [smem:[#allocation29_spill]]  ;;  %s4881_s13 = smov [#allocation8]  }
  0x7a   : > { %v5156_v3 = vld [vmem:[#allocation3] sm:$0x3]  ;;  %4145 = vmatprep.subr.mxu0 %v4879_v6  ;;  %4180 = vmatprep.subr.mxu1 %v4879_v6  ;;  %v5229_v22 = vld [vmem:[%s4915_s21 + $0x48] sm:$0xff]  ;;  %v5249_v26 = vld [vmem:[%s4915_s21 + $0x38] sm:$0xff]  ;;  %s6259_s15 = sld [smem:[#allocation31_spill]] }
  0x7b   : > { %v5154_v2 = vld [vmem:[#allocation2] sm:$0x3]  ;;  %v1199_v5 = vmul.f32 %v5156_v3, %v5156_v3  ;;  %4146 = vmatpush3.msra.mxu0 %v5181_v12  ;;  %4181 = vmatpush3.msra.mxu1 %v5186_v13  ;;  %v5256_v27 = vld [vmem:[%s6236_s17 + $0x30] sm:$0xff]  ;;  %v5266_v29 = vld [vmem:[%s6236_s17 + $0x28] sm:$0xff] }
  0x7c   : > { %v1198_v4 = vmul.f32 %v5154_v2, %v5154_v2  ;;  %4147 = vmatprep.subr.mxu0 %v4879_v6  ;;  %4182 = vmatprep.subr.mxu1 %v4879_v6  ;;  %v5239_v24 = vld [vmem:[%s4915_s21 + $0x40] sm:$0xff]  ;;  %v5259_v28 = vld [vmem:[%s4915_s21 + $0x30] sm:$0xff]  ;;  %v5269_v30 = vld [vmem:[%s4915_s21 + $0x28] sm:$0xff] }
  0x7d   : > { %4148 = vmatpush3.msra.mxu0 %v5192_v15  ;;  %4183 = vmatpush3.msra.mxu1 %v5196_v16  ;;  %v5276_v31 = vld [vmem:[%s6236_s17 + $0x20] sm:$0xff]  ;;  %v5286_v33 = vld [vmem:[%s6236_s17 + $0x18] sm:$0xff]  ;;  %v5296_v35 = vld [vmem:[%s6236_s17 + $0x10] sm:$0xff] }
  0x7e   : > { %v1200_v11 = vadd.f32 %v1199_v5, %v1198_v4  ;;  %4149 = vmatprep.subr.mxu0 %v4879_v6  ;;  %4184 = vmatprep.subr.mxu1 %v4879_v6  ;;  %v5279_v32 = vld [vmem:[%s4915_s21 + $0x20] sm:$0xff]  ;;  %v5289_v34 = vld [vmem:[%s4915_s21 + $0x18] sm:$0xff]  ;;  %v5299_v36 = vld [vmem:[%s4915_s21 + $0x10] sm:$0xff] }
  0x7f   : > { %4150 = vmatpush3.msra.mxu0 %v5201_v17  ;;  %4185 = vmatpush3.msra.mxu1 %v5206_v18  ;;  %v5306_v37 = vld [vmem:[%s6236_s17 + $0x8] sm:$0xff]  ;;  %v5314_v39 = vld [vmem:[%s6236_s17] sm:$0xff] }
  0x80   : > { %v1202_v14 = vsel %vm1201_vm1, %v1200_v11, 0.0  ;;  %4151 = vmatprep.subr.mxu0 %v4879_v6  ;;  %4186 = vmatprep.subr.mxu1 %v4879_v6  ;;  %v5309_v38 = vld [vmem:[%s4915_s21 + $0x8] sm:$0xff]  ;;  %v5317_v40 = vld [vmem:[%s4915_s21] sm:$0xff] }
  0x81   : > { %1203 = vadd.xlane.f32.xlu0 %v1202_v14  ;;  %4152 = vmatpush3.msra.mxu0 %v5211_v19  ;;  %v1210_v43 = vld [vmem:[%s6251_s5] sm:$0x3]  ;;  %s6275_s5 = scalar_lea.vmem [#allocation8], %s5136_s22 }
  0x82   : > { %4187 = vmatpush3.msra.mxu1 %v5216_v20  ;;  %4153 = vmatprep.subr.mxu0 %v4879_v6  ;;  %v1211_v44 = vld [vmem:[%s6252_s9] sm:$0x3]  ;;  %s3460_s6 = sshll.u32 %s6275_s5, 4  ;;  %s3461_s6 = int_to_ptr.vmem [resolvable:$true] %s3460_s6 }
  0x83   : > { %4188 = vmatprep.subr.mxu1 %v4879_v6  ;;  %4154 = vmatpush3.msra.mxu0 %v5226_v21 }
  0x84   : > { %4189 = vmatpush3.msra.mxu1 %v5229_v22  ;;  %4155 = vmatprep.subr.mxu0 %v4879_v6 }
  0x85   : > { %4190 = vmatprep.subr.mxu1 %v4879_v6  ;;  %4156 = vmatpush3.msra.mxu0 %v5236_v23 }
  0x86   : > { %4191 = vmatpush3.msra.mxu1 %v5239_v24  ;;  %4157 = vmatprep.subr.mxu0 %v4879_v6 }
  0x87   : > { %4192 = vmatprep.subr.mxu1 %v4879_v6  ;;  %4158 = vmatpush3.msra.mxu0 %v5246_v25 }
  0x88   : > { %4193 = vmatpush3.msra.mxu1 %v5249_v26  ;;  %4159 = vmatprep.subr.mxu0 %v4879_v6 }
  0x89   : > { %4194 = vmatprep.subr.mxu1 %v4879_v6  ;;  %4160 = vmatpush3.msra.mxu0 %v5256_v27 }
  0x8a   : > { %4195 = vmatpush3.msra.mxu1 %v5259_v28  ;;  %4161 = vmatprep.subr.mxu0 %v4879_v6 }
  0x8b   : > { %4196 = vmatprep.subr.mxu1 %v4879_v6  ;;  %4162 = vmatpush3.msra.mxu0 %v5266_v29 }
  0x8c   : > { %4197 = vmatpush3.msra.mxu1 %v5269_v30  ;;  %4163 = vmatprep.subr.mxu0 %v4879_v6 }
  0x8d   : > { %4198 = vmatprep.subr.mxu1 %v4879_v6  ;;  %4164 = vmatpush3.msra.mxu0 %v5276_v31 }
  0x8e   : > { %4199 = vmatpush3.msra.mxu1 %v5279_v32  ;;  %4165 = vmatprep.subr.mxu0 %v4879_v6 }
  0x8f   : > { %4200 = vmatprep.subr.mxu1 %v4879_v6  ;;  %4166 = vmatpush3.msra.mxu0 %v5286_v33 }
  0x90   : > { %4201 = vmatpush3.msra.mxu1 %v5289_v34  ;;  %4167 = vmatprep.subr.mxu0 %v4879_v6 }
  0x91   : > { %4202 = vmatprep.subr.mxu1 %v4879_v6  ;;  %4168 = vmatpush3.msra.mxu0 %v5296_v35 }
  0x92   : > { %4203 = vmatpush3.msra.mxu1 %v5299_v36  ;;  %4169 = vmatprep.subr.mxu0 %v4879_v6 }
  0x93   : > { %4204 = vmatprep.subr.mxu1 %v4879_v6  ;;  %4170 = vmatpush3.msra.mxu0 %v5306_v37 }
  0x94   : > { %4205 = vmatpush3.msra.mxu1 %v5309_v38  ;;  %4171 = vmatprep.subr.mxu0 %v4879_v6 }
  0x95   : > { %4206 = vmatprep.subr.mxu1 %v4879_v6  ;;  %4172 = vmatpush3.msra.mxu0 %v5314_v39 }
  0x96   : > { %4207 = vmatpush3.msra.mxu1 %v5317_v40  ;;  %4173 = vmatprep.mubr.msk.f32.mxu0 %vm4880_vm2, %v4879_v6 }
  0x97   : > { %4208 = vmatprep.mubr.msk.f32.mxu1 %vm4880_vm2, %v4879_v6  ;;  %4211 = vmatprep.subr.mxu0 %v4879_v6 }
  0x98   : > { %4246 = vmatprep.subr.mxu1 %v4879_v6 }
 0x10a   : > { %v1204_v41 = vpop.xlane.xlu0 %1203 }
 0x10b   : > { %4627 = vrsqrt.f32 %v1204_v41 }
 0x118   : > { %v4628_v42 = vpop.eup %4627 }
 0x119   : > { %v5332_v45 = vmul.f32 %v4628_v42, %v5154_v2  ;;  %v5335_v46 = vmul.f32 %v4628_v42, %v5156_v3  ;;  %v1534_v3 = vlaneseq }
 0x11b   : > { %1208 = vst [vmem:[%s6191_s18] sm:$0x3] %v5332_v45  ;;  %1209 = vst [vmem:[%s6193_s1] sm:$0x3] %v5335_v46  ;;  %v1212_v47 = vmul.f32 %v1210_v43, %v5332_v45  ;;  %v1213_v48 = vmul.f32 %v1211_v44, %v5335_v46  ;;  %v1215_v49 = vmul.f32 %v1210_v43, %v5335_v46  ;;  %v1535_v4 = vand.u32 127, %v1534_v3  ;;  %s6261_s18 = sld [smem:[#allocation34_spill]] }
 0x11c   : > { %v1216_v50 = vmul.f32 %v1211_v44, %v5332_v45  ;;  %s6263_s1 = sld [smem:[#allocation39_spill]] }
 0x11d   : > { %v5347_v51 = vsub.f32 %v1212_v47, %v1213_v48 }
 0x11e   : > { %v5349_v52 = vadd.f32 %v1216_v50, %v1215_v49 }
 0x11f   : > { %4174 = vmatmul.mubr.f32.vlgmr.msra.gmra.mxu0 %v5347_v51 }
 0x120   : > { %4209 = vmatmul.mubr.f32.vlgmr.msra.gmra.mxu1 %v5349_v52  ;;  %4212 = vmatpush3.msra.mxu0 %v5165_v7 }
 0x121   : > { %4247 = vmatpush3.msra.mxu1 %v5168_v8  ;;  %4213 = vmatprep.subr.mxu0 %v4879_v6 }
 0x122   : > { %4248 = vmatprep.subr.mxu1 %v4879_v6  ;;  %4214 = vmatpush3.msra.mxu0 %v5171_v9 }
 0x123   : > { %4249 = vmatpush3.msra.mxu1 %v5176_v10  ;;  %4215 = vmatprep.subr.mxu0 %v4879_v6 }
 0x124   : > { %4250 = vmatprep.subr.mxu1 %v4879_v6  ;;  %4216 = vmatpush3.msra.mxu0 %v5181_v12 }
 0x125   : > { %4251 = vmatpush3.msra.mxu1 %v5186_v13  ;;  %4217 = vmatprep.subr.mxu0 %v4879_v6 }
 0x126   : > { %4252 = vmatprep.subr.mxu1 %v4879_v6  ;;  %4218 = vmatpush3.msra.mxu0 %v5192_v15  ;;  %v1563_v15 = vld [vmem:[%s4920_s25 + $0x8] sm:$0xff] }
 0x127   : > { %4253 = vmatpush3.msra.mxu1 %v5196_v16  ;;  %4219 = vmatprep.subr.mxu0 %v4879_v6  ;;  %v1639_v16 = vld [vmem:[%s4925_s29 + $0x8] sm:$0xff] }
 0x128   : > { %4254 = vmatprep.subr.mxu1 %v4879_v6  ;;  %4220 = vmatpush3.msra.mxu0 %v5201_v17  ;;  %v1562_v17 = vld [vmem:[%s4920_s25] sm:$0xff] }
 0x129   : > { %4255 = vmatpush3.msra.mxu1 %v5206_v18  ;;  %4221 = vmatprep.subr.mxu0 %v4879_v6  ;;  %v1638_v18 = vld [vmem:[%s4925_s29] sm:$0xff] }
 0x12a   : > { %4256 = vmatprep.subr.mxu1 %v4879_v6  ;;  %4222 = vmatpush3.msra.mxu0 %v5211_v19 }
 0x12b   : > { %4257 = vmatpush3.msra.mxu1 %v5216_v20  ;;  %4223 = vmatprep.subr.mxu0 %v4879_v6 }
 0x12c   : > { %4258 = vmatprep.subr.mxu1 %v4879_v6  ;;  %4224 = vmatpush3.msra.mxu0 %v5226_v21 }
 0x12d   : > { %4259 = vmatpush3.msra.mxu1 %v5229_v22  ;;  %4225 = vmatprep.subr.mxu0 %v4879_v6 }
 0x12e   : > { %4260 = vmatprep.subr.mxu1 %v4879_v6  ;;  %4226 = vmatpush3.msra.mxu0 %v5236_v23 }
 0x12f   : > { %4261 = vmatpush3.msra.mxu1 %v5239_v24  ;;  %4227 = vmatprep.subr.mxu0 %v4879_v6  ;;  %v5443_v24 = vld [vmem:[%s6239_s3 + $0x78] sm:$0xff] }
 0x130   : > { %4262 = vmatprep.subr.mxu1 %v4879_v6  ;;  %4228 = vmatpush3.msra.mxu0 %v5246_v25 }
 0x131   : > { %4263 = vmatpush3.msra.mxu1 %v5249_v26  ;;  %4229 = vmatprep.subr.mxu0 %v4879_v6  ;;  %v5447_v26 = vld [vmem:[%s6239_s3 + $0x70] sm:$0xff] }
 0x132   : > { %4264 = vmatprep.subr.mxu1 %v4879_v6  ;;  %4230 = vmatpush3.msra.mxu0 %v5256_v27  ;;  %v5454_v27 = vld [vmem:[%s6239_s3 + $0x68] sm:$0xff] }
 0x133   : > { %4265 = vmatpush3.msra.mxu1 %v5259_v28  ;;  %4231 = vmatprep.subr.mxu0 %v4879_v6  ;;  %v5461_v28 = vld [vmem:[%s6239_s3 + $0x60] sm:$0xff] }
 0x134   : > { %4266 = vmatprep.subr.mxu1 %v4879_v6  ;;  %4232 = vmatpush3.msra.mxu0 %v5266_v29  ;;  %v5468_v29 = vld [vmem:[%s6239_s3 + $0x58] sm:$0xff] }
 0x135   : > { %4267 = vmatpush3.msra.mxu1 %v5269_v30  ;;  %4233 = vmatprep.subr.mxu0 %v4879_v6  ;;  %v5475_v30 = vld [vmem:[%s6239_s3 + $0x50] sm:$0xff] }
 0x136   : > { %4268 = vmatprep.subr.mxu1 %v4879_v6  ;;  %4234 = vmatpush3.msra.mxu0 %v5276_v31  ;;  %v5482_v31 = vld [vmem:[%s6239_s3 + $0x48] sm:$0xff] }
 0x137   : > { %4269 = vmatpush3.msra.mxu1 %v5279_v32  ;;  %4235 = vmatprep.subr.mxu0 %v4879_v6  ;;  %v5489_v32 = vld [vmem:[%s6239_s3 + $0x40] sm:$0xff] }
 0x138   : > { %4270 = vmatprep.subr.mxu1 %v4879_v6  ;;  %4236 = vmatpush3.msra.mxu0 %v5286_v33  ;;  %v5496_v33 = vld [vmem:[%s6239_s3 + $0x38] sm:$0xff] }
 0x139   : > { %4271 = vmatpush3.msra.mxu1 %v5289_v34  ;;  %4237 = vmatprep.subr.mxu0 %v4879_v6  ;;  %v5503_v34 = vld [vmem:[%s6239_s3 + $0x30] sm:$0xff] }
 0x13a   : > { %4272 = vmatprep.subr.mxu1 %v4879_v6  ;;  %4238 = vmatpush3.msra.mxu0 %v5296_v35  ;;  %v5510_v35 = vld [vmem:[%s6239_s3 + $0x28] sm:$0xff] }
 0x13b   : > { %4273 = vmatpush3.msra.mxu1 %v5299_v36  ;;  %4239 = vmatprep.subr.mxu0 %v4879_v6  ;;  %v5517_v36 = vld [vmem:[%s6239_s3 + $0x20] sm:$0xff] }
 0x13c   : > { %4274 = vmatprep.subr.mxu1 %v4879_v6  ;;  %4240 = vmatpush3.msra.mxu0 %v5306_v37  ;;  %v5524_v37 = vld [vmem:[%s6239_s3 + $0x18] sm:$0xff] }
 0x13d   : > { %4275 = vmatpush3.msra.mxu1 %v5309_v38  ;;  %4241 = vmatprep.subr.mxu0 %v4879_v6  ;;  %v5531_v38 = vld [vmem:[%s6239_s3 + $0x10] sm:$0xff] }
 0x13e   : > { %4276 = vmatprep.subr.mxu1 %v4879_v6  ;;  %4242 = vmatpush3.msra.mxu0 %v5314_v39  ;;  %v5546_v39 = vld [vmem:[%s6239_s3 + $0x8] sm:$0xff] }
 0x13f   : > { %4243 = vmatprep.mubr.msk.f32.mxu0 %vm4880_vm2, %v4879_v6  ;;  %4277 = vmatpush3.msra.mxu1 %v5317_v40  ;;  %v5553_v40 = vld [vmem:[%s6239_s3] sm:$0xff] }
 0x140   : > { %4278 = vmatprep.mubr.msk.f32.mxu1 %vm4880_vm2, %v4879_v6  ;;  %4244 = vmatmul.mubr.f32.vlgmr.msra.gmra.mxu0 %v5349_v52 }
 0x141   : > { %4279 = vmatmul.mubr.f32.vlgmr.msra.gmra.mxu1 %v5347_v51  ;;  %4281 = vmatprep.subr.mxu0 %v4879_v6 }
 0x142   : > { %4288 = vmatprep.subr.mxu1 %v4879_v6  ;;  %4285 = vmatprep.mubr.msk.f32.mxu0 %vm4880_vm2, %v4879_v6 }
 0x143   : > { %4292 = vmatprep.mubr.msk.f32.mxu1 %vm4880_vm2, %v4879_v6  ;;  %4282 = vmatpush3.msra.mxu0 %v1563_v15 }
 0x144   : > { %4289 = vmatpush3.msra.mxu1 %v1639_v16  ;;  %4283 = vmatprep.subr.mxu0 %v4879_v6 }
 0x145   : > { %4290 = vmatprep.subr.mxu1 %v4879_v6  ;;  %4284 = vmatpush3.msra.mxu0 %v1562_v17 }
 0x146   : > { %4291 = vmatpush3.msra.mxu1 %v1638_v18  ;;  %4295 = vmatprep.subr.mxu0 %v4879_v6 }
 0x147   : > { %4330 = vmatprep.subr.mxu1 %v4879_v6 }
 0x1df   : > { %v1316_v53 = vpop.f32.mrf.mxu0 }
 0x1e0   : > { %v1386_v54 = vpop.f32.mrf.mxu1 }
 0x1e1   : > { %v4175_v55 = vpop.f32.mrf.mxu0  ;;  %v1390_v57 = vsub.f32 %v1316_v53, %v1386_v54 }
 0x1e2   : > { %v4210_v56 = vpop.f32.mrf.mxu1 }
 0x1e3   : > { %v1531_v63 = vmul.f32 %v1390_v57, %v1390_v57 }
 0x200   : > { %v1457_v58 = vpop.f32.mrf.mxu0 }
 0x201   : > { %v1527_v59 = vpop.f32.mrf.mxu1 }
 0x202   : > { %v1528_v60 = vadd.f32 %v1527_v59, %v1457_v58  ;;  %v4245_v61 = vpop.f32.mrf.mxu0 }
 0x203   : > { %v4280_v62 = vpop.f32.mrf.mxu1 }
 0x204   : > { %v1532_v0 = vmul.f32 %v1528_v60, %v1528_v60 }
 0x206   : > { %v1533_v1 = vadd.f32 %v1532_v0, %v1531_v63  ;;  %v2032_v63 = vld [vmem:[%s4950_s24 + $0x10] sm:$0xff]  ;;  %v2292_v0 = vld [vmem:[%s6238_s4 + $0x8] sm:$0xff] }
 0x208   : > { %v1537_v2 = vsel %vm1536_vm3, %v1533_v1, -inf }
 0x209   : > { %1538 = vmax.xlane.f32.xlu0 %v1537_v2  ;;  %v2291_v2 = vld [vmem:[%s6238_s4] sm:$0xff] }
 0x292   : > { %v1539_v5 = vpop.xlane.xlu0 %1538 }
 0x293   : > { %vm1540_vm4 = vcmp.eq.f32.partialorder %v1533_v1, %v1539_v5  ;;  %v2030_v1 = vld [vmem:[%s4950_s24] sm:$0xff] }
 0x294   : > { %v1541_v7 = vsel %vm1540_vm4, %v1535_v4, 16 }
 0x295   : > { %v1542_v8 = vsel %vm1536_vm3, %v1541_v7, 2147483647 }
 0x296   : > { %v1544_v9 = vshra.s32 %v1542_v8, 16  ;;  %v1543_v11 = vand.u32 65535, %v1542_v8 }
 0x298   : > { %v1546_v10 = vcvt.s32.f32 %v1544_v9  ;;  %v1545_v13 = vcvt.s32.f32 %v1543_v11 }
 0x29a   : > { %1547 = vmin.xlane.f32.xlu1 %v1546_v10 }
 0x323   : > { %v1548_v12 = vpop.xlane.xlu1 %1547 }
 0x324   : > { %vm1549_vm5 = vcmp.eq.f32.partialorder %v1546_v10, %v1548_v12  ;;  %v1554_v19 = vcvt.f32.s32 %v1548_v12 }
 0x325   : > { %v1550_v14 = vsel %vm1549_vm5, %v1545_v13, inf }
 0x326   : > { %1551 = vmin.xlane.f32.xlu1 %v1550_v14  ;;  %v1555_v21 = vshll.u32 %v1554_v19, 16 }
 0x3af   : > { %v1552_v20 = vpop.xlane.xlu1 %1551 }
 0x3b0   : > { %v1553_v22 = vcvt.f32.s32 %v1552_v20 }
 0x3b2   : > { %v5436_v23 = vadd.s32 %v1555_v21, %v1553_v22  ;;  %v2029_v22 = vld [vmem:[%s6235_s19 + $0x18] sm:$0xff] }
 0x3b4   : > { %1558 = vst.msk [vmem:[%s5144_s11] sm:$0x3] %vm1557_vm6, %v5436_v23  ;;  %vm1559_vm8 = vcmp.eq.s32.totalorder %v1535_v4, %v5436_v23  ;;  %s6253_s11 = sld [smem:[#allocation36_spill]] }
 0x3b5   : > { %v3816_v25 = vsel %vm1559_vm8, 1.0, %v4879_v6 }
 0x3b6   : > { %4286 = vmatmul.mubr.msk.f32.vlgmr.msra.gmra.mxu0 %vm1564_vm7, %v3816_v25  ;;  %4293 = vmatmul.mubr.msk.f32.vlgmr.msra.gmra.mxu1 %vm1564_vm7, %v3816_v25 }
 0x3b7   : > { %4296 = vmatpush3.msra.mxu0 %v5443_v24  ;;  %4331 = vmatpush3.msra.mxu1 %v5443_v24 }
 0x3b8   : > { %4297 = vmatprep.subr.mxu0 %v4879_v6  ;;  %4332 = vmatprep.subr.mxu1 %v4879_v6 }
 0x3b9   : > { %4298 = vmatpush3.msra.mxu0 %v5447_v26  ;;  %4333 = vmatpush3.msra.mxu1 %v5447_v26 }
 0x3ba   : > { %4299 = vmatprep.subr.mxu0 %v4879_v6  ;;  %4334 = vmatprep.subr.mxu1 %v4879_v6  ;;  %s6254_s16 = smov %s6253_s11 }
 0x3bb   : > { %4300 = vmatpush3.msra.mxu0 %v5454_v27  ;;  %4335 = vmatpush3.msra.mxu1 %v5454_v27 }
 0x3bc   : > { %4301 = vmatprep.subr.mxu0 %v4879_v6  ;;  %4336 = vmatprep.subr.mxu1 %v4879_v6 }
 0x3bd   : > { %4302 = vmatpush3.msra.mxu0 %v5461_v28  ;;  %4337 = vmatpush3.msra.mxu1 %v5461_v28 }
 0x3be   : > { %4303 = vmatprep.subr.mxu0 %v4879_v6  ;;  %4338 = vmatprep.subr.mxu1 %v4879_v6 }
 0x3bf   : > { %4304 = vmatpush3.msra.mxu0 %v5468_v29  ;;  %4339 = vmatpush3.msra.mxu1 %v5468_v29 }
 0x3c0   : > { %4305 = vmatprep.subr.mxu0 %v4879_v6  ;;  %4340 = vmatprep.subr.mxu1 %v4879_v6 }
 0x3c1   : > { %4306 = vmatpush3.msra.mxu0 %v5475_v30  ;;  %4341 = vmatpush3.msra.mxu1 %v5475_v30 }
 0x3c2   : > { %4307 = vmatprep.subr.mxu0 %v4879_v6  ;;  %4342 = vmatprep.subr.mxu1 %v4879_v6 }
 0x3c3   : > { %4308 = vmatpush3.msra.mxu0 %v5482_v31  ;;  %4343 = vmatpush3.msra.mxu1 %v5482_v31 }
 0x3c4   : > { %4309 = vmatprep.subr.mxu0 %v4879_v6  ;;  %4344 = vmatprep.subr.mxu1 %v4879_v6 }
 0x3c5   : > { %4310 = vmatpush3.msra.mxu0 %v5489_v32  ;;  %4345 = vmatpush3.msra.mxu1 %v5489_v32 }
 0x3c6   : > { %4311 = vmatprep.subr.mxu0 %v4879_v6  ;;  %4346 = vmatprep.subr.mxu1 %v4879_v6 }
 0x3c7   : > { %4312 = vmatpush3.msra.mxu0 %v5496_v33  ;;  %4347 = vmatpush3.msra.mxu1 %v5496_v33 }
 0x3c8   : > { %4313 = vmatprep.subr.mxu0 %v4879_v6  ;;  %4348 = vmatprep.subr.mxu1 %v4879_v6 }
 0x3c9   : > { %4314 = vmatpush3.msra.mxu0 %v5503_v34  ;;  %4349 = vmatpush3.msra.mxu1 %v5503_v34 }
 0x3ca   : > { %4315 = vmatprep.subr.mxu0 %v4879_v6  ;;  %4350 = vmatprep.subr.mxu1 %v4879_v6 }
 0x3cb   : > { %4316 = vmatpush3.msra.mxu0 %v5510_v35  ;;  %4351 = vmatpush3.msra.mxu1 %v5510_v35 }
 0x3cc   : > { %4317 = vmatprep.subr.mxu0 %v4879_v6  ;;  %4352 = vmatprep.subr.mxu1 %v4879_v6 }
 0x3cd   : > { %4318 = vmatpush3.msra.mxu0 %v5517_v36  ;;  %4353 = vmatpush3.msra.mxu1 %v5517_v36 }
 0x3ce   : > { %4319 = vmatprep.subr.mxu0 %v4879_v6  ;;  %4354 = vmatprep.subr.mxu1 %v4879_v6 }
 0x3cf   : > { %4320 = vmatpush3.msra.mxu0 %v5524_v37  ;;  %4355 = vmatpush3.msra.mxu1 %v5524_v37 }
 0x3d0   : > { %4321 = vmatprep.subr.mxu0 %v4879_v6  ;;  %4356 = vmatprep.subr.mxu1 %v4879_v6 }
 0x3d1   : > { %4322 = vmatpush3.msra.mxu0 %v5531_v38  ;;  %4357 = vmatpush3.msra.mxu1 %v5531_v38 }
 0x3d2   : > { %4323 = vmatprep.subr.mxu0 %v4879_v6  ;;  %4358 = vmatprep.subr.mxu1 %v4879_v6 }
 0x3d3   : > { %4327 = vmatprep.mubr.msk.f32.mxu0 %vm4880_vm2, %v4879_v6  ;;  %4362 = vmatprep.mubr.msk.f32.mxu1 %vm4880_vm2, %v4879_v6 }
 0x3d4   : > { %4324 = vmatpush3.msra.mxu0 %v5546_v39  ;;  %4359 = vmatpush3.msra.mxu1 %v5546_v39 }
 0x3d5   : > { %4325 = vmatprep.subr.mxu0 %v4879_v6  ;;  %4360 = vmatprep.subr.mxu1 %v4879_v6 }
 0x3d6   : > { %4326 = vmatpush3.msra.mxu0 %v5553_v40  ;;  %4361 = vmatpush3.msra.mxu1 %v5553_v40 }
 0x3d7   : > { %4365 = vmatprep.subr.mxu0 %v4879_v6  ;;  %4400 = vmatprep.subr.mxu1 %v4879_v6 }
 0x476   : > { %v1634_v41 = vpop.f32.mrf.mxu0  ;;  %v1706_v42 = vpop.f32.mrf.mxu1 }
 0x477   : > { %v1733_v43 = vmul.f32 %v1634_v41, %v5332_v45  ;;  %v1737_v44 = vmul.f32 %v1634_v41, %v5335_v46  ;;  %v1734_v47 = vmul.f32 %v1706_v42, %v5335_v46  ;;  %v1736_v48 = vmul.f32 %v1706_v42, %v5332_v45 }
 0x478   : > { %v4287_v49 = vpop.f32.mrf.mxu0  ;;  %v4294_v50 = vpop.f32.mrf.mxu1  ;;  %v1716_v53 = vmul.f32 %v1706_v42, %v5347_v51  ;;  %v1717_v54 = vmul.f32 %v1634_v41, %v5349_v52  ;;  %v1710_v55 = vmul.f32 %v1634_v41, %v5347_v51  ;;  %v1711_v56 = vmul.f32 %v1706_v42, %v5349_v52  ;;  %v2033_v51 = vld [vmem:[%s4950_s24 + $0x18] sm:$0xff]  ;;  %v2289_v41 = vld [vmem:[%s4975_s27 + $0x10] sm:$0xff]  ;;  %v2288_v42 = vld [vmem:[%s4975_s27 + $0x8] sm:$0xff] }
 0x479   : > { %v1735_v57 = vsub.f32 %v1733_v43, %v1734_v47  ;;  %v1738_v58 = vadd.f32 %v1737_v44, %v1736_v48  ;;  %v2294_v52 = vld [vmem:[%s6238_s4 + $0x18] sm:$0xff]  ;;  %v2287_v43 = vld [vmem:[%s4975_s27] sm:$0xff]  ;;  %v2549_v47 = vld [vmem:[%s6254_s16 + $0x30] sm:$0xff] }
 0x47a   : > { %v1718_v59 = vadd.f32 %v1717_v54, %v1716_v53  ;;  %v1712_v60 = vsub.f32 %v1710_v55, %v1711_v56  ;;  %v2550_v44 = vld [vmem:[%s6253_s11 + $0x38] sm:$0xff]  ;;  %v2548_v48 = vld [vmem:[%s6254_s16 + $0x28] sm:$0xff]  ;;  %v2547_v49 = vld [vmem:[%s6254_s16 + $0x20] sm:$0xff]  ;;  %s6257_s11 = sld [smem:[#allocation28_spill]] }
 0x47b   : > { %4328 = vmatmul.mubr.f32.vlgmr.msra.gmra.mxu0 %v1735_v57  ;;  %4363 = vmatmul.mubr.f32.vlgmr.msra.gmra.mxu1 %v1738_v58  ;;  %v2546_v50 = vld [vmem:[%s6254_s16 + $0x18] sm:$0xff]  ;;  %v2545_v53 = vld [vmem:[%s6254_s16 + $0x10] sm:$0xff]  ;;  %v2544_v54 = vld [vmem:[%s6254_s16 + $0x8] sm:$0xff] }
 0x47c   : > { %4366 = vmatpush3.msra.mxu0 %v5443_v24  ;;  %4401 = vmatpush3.msra.mxu1 %v5443_v24  ;;  %v1719_v61 = vsel %vm1201_vm1, %v1718_v59, 0.0  ;;  %v1713_v62 = vsel %vm1201_vm1, %v1712_v60, 0.0  ;;  %v2543_v55 = vld [vmem:[%s6254_s16] sm:$0xff]  ;;  %v2817_v60 = vld [vmem:[%s6256_s23 + $0x68] sm:$0xff]  ;;  %s4641_s16 = sshll.u32 %s4881_s13, 4  ;;  %s4642_s16 = int_to_ptr.vmem [resolvable:$false] %s4641_s16 }
 0x47d   : > { %4367 = vmatprep.subr.mxu0 %v4879_v6  ;;  %4402 = vmatprep.subr.mxu1 %v4879_v6  ;;  %s4643_s17 = scalar_lea.vmem %s4642_s16, 64  ;;  %p4644_p1 = scmp.lt.s32.totalorder %s3461_s6, %s4642_s16 }
 0x47e   : > { %1720 = vadd.xlane.f32.xlu1 %v1719_v61  ;;  %1714 = vadd.xlane.f32.xlu0 %v1713_v62 }
 0x47f   : > { %4368 = vmatpush3.msra.mxu0 %v5447_v26  ;;  %4403 = vmatpush3.msra.mxu1 %v5447_v26  ;;  %v2457_v26 = vld [vmem:[%s4995_s20 + $0x18] sm:$0xff] }
 0x480   : > { %4369 = vmatprep.subr.mxu0 %v4879_v6  ;;  %4404 = vmatprep.subr.mxu1 %v4879_v6 }
 0x481   : > { %4370 = vmatpush3.msra.mxu0 %v5454_v27  ;;  %4405 = vmatpush3.msra.mxu1 %v5454_v27  ;;  %v2028_v27 = vld [vmem:[%s6235_s19 + $0x10] sm:$0xff] }
 0x482   : > { %4371 = vmatprep.subr.mxu0 %v4879_v6  ;;  %4406 = vmatprep.subr.mxu1 %v4879_v6 }
 0x483   : > { %4372 = vmatpush3.msra.mxu0 %v5461_v28  ;;  %4407 = vmatpush3.msra.mxu1 %v5461_v28  ;;  %v2456_v28 = vld [vmem:[%s4995_s20 + $0x10] sm:$0xff] }
 0x484   : > { %4373 = vmatprep.subr.mxu0 %v4879_v6  ;;  %4408 = vmatprep.subr.mxu1 %v4879_v6 }
 0x485   : > { %4374 = vmatpush3.msra.mxu0 %v5468_v29  ;;  %4409 = vmatpush3.msra.mxu1 %v5468_v29  ;;  %v2027_v29 = vld [vmem:[%s6235_s19 + $0x8] sm:$0xff] }
 0x486   : > { %4375 = vmatprep.subr.mxu0 %v4879_v6  ;;  %4410 = vmatprep.subr.mxu1 %v4879_v6 }
 0x487   : > { %4376 = vmatpush3.msra.mxu0 %v5475_v30  ;;  %4411 = vmatpush3.msra.mxu1 %v5475_v30  ;;  %v2455_v30 = vld [vmem:[%s4995_s20 + $0x8] sm:$0xff] }
 0x488   : > { %4377 = vmatprep.subr.mxu0 %v4879_v6  ;;  %4412 = vmatprep.subr.mxu1 %v4879_v6 }
 0x489   : > { %4378 = vmatpush3.msra.mxu0 %v5482_v31  ;;  %4413 = vmatpush3.msra.mxu1 %v5482_v31  ;;  %v2026_v31 = vld [vmem:[%s6235_s19] sm:$0xff] }
 0x48a   : > { %4379 = vmatprep.subr.mxu0 %v4879_v6  ;;  %4414 = vmatprep.subr.mxu1 %v4879_v6 }
 0x48b   : > { %4380 = vmatpush3.msra.mxu0 %v5489_v32  ;;  %4415 = vmatpush3.msra.mxu1 %v5489_v32 }
 0x48c   : > { %4381 = vmatprep.subr.mxu0 %v4879_v6  ;;  %4416 = vmatprep.subr.mxu1 %v4879_v6 }
 0x48d   : > { %4382 = vmatpush3.msra.mxu0 %v5496_v33  ;;  %4417 = vmatpush3.msra.mxu1 %v5496_v33  ;;  %v2203_v33 = vld [vmem:[%s6237_s12 + $0x18] sm:$0xff] }
 0x48e   : > { %4383 = vmatprep.subr.mxu0 %v4879_v6  ;;  %4418 = vmatprep.subr.mxu1 %v4879_v6 }
 0x48f   : > { %4384 = vmatpush3.msra.mxu0 %v5503_v34  ;;  %4419 = vmatpush3.msra.mxu1 %v5503_v34  ;;  %v2454_v34 = vld [vmem:[%s4995_s20] sm:$0xff] }
 0x490   : > { %4385 = vmatprep.subr.mxu0 %v4879_v6  ;;  %4420 = vmatprep.subr.mxu1 %v4879_v6 }
 0x491   : > { %4386 = vmatpush3.msra.mxu0 %v5510_v35  ;;  %4421 = vmatpush3.msra.mxu1 %v5510_v35  ;;  %v2202_v35 = vld [vmem:[%s6237_s12 + $0x10] sm:$0xff] }
 0x492   : > { %4387 = vmatprep.subr.mxu0 %v4879_v6  ;;  %4422 = vmatprep.subr.mxu1 %v4879_v6 }
 0x493   : > { %4388 = vmatpush3.msra.mxu0 %v5517_v36  ;;  %4423 = vmatpush3.msra.mxu1 %v5517_v36  ;;  %v2453_v36 = vld [vmem:[#allocation5] sm:$0x3] }
 0x494   : > { %4389 = vmatprep.subr.mxu0 %v4879_v6  ;;  %4424 = vmatprep.subr.mxu1 %v4879_v6 }
 0x495   : > { %4390 = vmatpush3.msra.mxu0 %v5524_v37  ;;  %4425 = vmatpush3.msra.mxu1 %v5524_v37  ;;  %v2201_v37 = vld [vmem:[%s6237_s12 + $0x8] sm:$0xff] }
 0x496   : > { %4391 = vmatprep.subr.mxu0 %v4879_v6  ;;  %4426 = vmatprep.subr.mxu1 %v4879_v6 }
 0x497   : > { %4392 = vmatpush3.msra.mxu0 %v5531_v38  ;;  %4427 = vmatpush3.msra.mxu1 %v5531_v38  ;;  %v2200_v38 = vld [vmem:[%s6237_s12] sm:$0xff]  ;;  %s4637_s12 = scalar_lea.vmem %s3461_s6, 32 }
 0x498   : > { %4393 = vmatprep.subr.mxu0 %v4879_v6  ;;  %4428 = vmatprep.subr.mxu1 %v4879_v6  ;;  %p4638_p12 = scmp.ne.s32.totalorder %s3461_s6, %s4637_s12  ;;  %p4645_p2 = scmp.lt.s32.totalorder %s4643_s17, %s4637_s12 }
 0x499   : > { %4394 = vmatpush3.msra.mxu0 %v5546_v39  ;;  %4429 = vmatpush3.msra.mxu1 %v5546_v39  ;;  %v2199_v39 = vld [vmem:[#allocation4] sm:$0x3] }
 0x49a   : > { %4395 = vmatprep.subr.mxu0 %v4879_v6  ;;  %4430 = vmatprep.subr.mxu1 %v4879_v6  ;;  %p4639_p13 = pnand %p4638_p12, %p5122_p5  ;;  %p4646_p3 = por %p4645_p2, %p4644_p1 }
 0x49b   : > { %4396 = vmatpush3.msra.mxu0 %v5553_v40  ;;  %4397 = vmatprep.mubr.msk.f32.mxu0 %vm4880_vm2, %v4879_v6 }
 0x49c   : > { %4431 = vmatpush3.msra.mxu1 %v5553_v40  ;;  %4432 = vmatprep.mubr.msk.f32.mxu1 %vm4880_vm2, %v4879_v6  ;;  %v2290_v40 = vld [vmem:[%s4975_s27 + $0x18] sm:$0xff]  ;;  %p4640_p0 = pneg %p4639_p13 }
 0x49d   : > { %4398 = vmatmul.mubr.f32.vlgmr.msra.gmra.mxu0 %v5332_v45  ;;  %4433 = vmatmul.mubr.f32.vlgmr.msra.gmra.mxu1 %v5335_v46  ;;  %v2293_v45 = vld [vmem:[%s6238_s4 + $0x10] sm:$0xff]  ;;  %v2031_v46 = vld [vmem:[%s4950_s24 + $0x8] sm:$0xff] }
 0x49e   : > { %4435 = vmatprep.subr.mxu0 %v4879_v6  ;;  %4468 = vmatprep.subr.mxu1 %v4879_v6  ;;  %p4647_p4 = pnand %p4646_p3, %p4640_p0 }
 0x49f   : > { %4443 = vmatprep.mubr.msk.f32.mxu0 %vm4880_vm2, %v4879_v6  ;;  %4476 = vmatprep.mubr.msk.f32.mxu1 %vm4880_vm2, %v4879_v6 }
 0x4a0   : > { %4436 = vmatpush3.msra.mxu0 %v2033_v51  ;;  %4469 = vmatpush3.msra.mxu1 %v2294_v52 }
 0x4a1   : > { %4437 = vmatprep.subr.mxu0 %v4879_v6  ;;  %4470 = vmatprep.subr.mxu1 %v4879_v6 }
 0x4a2   : > { %4438 = vmatpush3.msra.mxu0 %v2032_v63  ;;  %4471 = vmatpush3.msra.mxu1 %v2293_v45  ;;  %v2024_v63 = vcvt.s32.f32 %v5436_v23  ;;  %v3821_v45 = vld [vmem:[%s6257_s11] ss:$0 sm:$0xff]  ;;  %s6269_s11 = sld [smem:[#allocation41_spill]] }
 0x4a3   : > { %4439 = vmatprep.subr.mxu0 %v4879_v6  ;;  %4472 = vmatprep.subr.mxu1 %v4879_v6 }
 0x4a4   : > { %4440 = vmatpush3.msra.mxu0 %v2031_v46  ;;  %4473 = vmatpush3.msra.mxu1 %v2292_v0  ;;  %v2025_v46 = vmul.f32 0.0625, %v2024_v63 }
 0x4a5   : > { %4441 = vmatprep.subr.mxu0 %v4879_v6  ;;  %4474 = vmatprep.subr.mxu1 %v4879_v6 }
 0x4a6   : > { %4442 = vmatpush3.msra.mxu0 %v2030_v1  ;;  %4475 = vmatpush3.msra.mxu1 %v2291_v2  ;;  %v3822_v1 = vld [vmem:[%s6258_s8] ss:$0 sm:$0xff]  ;;  %s6264_s8 = sld [smem:[#allocation25_spill]] }
 0x4a7   : > { %4446 = vmatprep.subr.mxu0 %v4879_v6  ;;  %4490 = vmatprep.subr.mxu1 %v4879_v6 }
 0x507   : > { %v1721_v4 = vpop.xlane.xlu1 %1720  ;;  %v1715_v5 = vpop.xlane.xlu0 %1714 }
 0x508   : > { %v1723_v7 = vmul.f32 %v1721_v4, %v1721_v4  ;;  %v1722_v8 = vmul.f32 %v1715_v5, %v1715_v5 }
 0x50a   : > { %v1724_v9 = vadd.f32 %v1723_v7, %v1722_v8  ;;  %v2197_v8 = vmul.f32 %v3822_v1, %v2025_v46  ;;  %v5834_v1 = vld [vmem:[%s6264_s8 + $0x48] sm:$0xff] }
 0x50c   : > { %4629 = vrsqrt.f32 %v1724_v9  ;;  %vm1727_vm9 = vcmp.eq.f32.partialorder %v1724_v9, inf  ;;  %v1730_v12 = vand.u32 2147483648, %v1724_v9  ;;  %vm1729_vm10 = vcmp.eq.f32.partialorder %v1724_v9, 0.0 }
 0x519   : > { %v4630_v10 = vpop.eup %4629 }
 0x51a   : > { %v1726_v11 = vmul.f32 %v4630_v10, %v1724_v9 }
 0x51c   : > { %v1728_v13 = vsel %vm1727_vm9, %v1724_v9, %v1726_v11 }
 0x51d   : > { %v5659_v14 = vsel %vm1729_vm10, %v1730_v12, %v1728_v13  ;;  %v3824_v13 = vld [vmem:[%s6259_s15] ss:$0 sm:$0xff]  ;;  %s6268_s15 = sld [smem:[#allocation40_spill]] }
 0x51e   : > { %1732 = vst.msk [vmem:[%s5141_s26] sm:$0x3] %vm1557_vm6, %v5659_v14  ;;  %s6255_s26 = sld [smem:[#allocation38_spill]]  ;;  %v2188_v4 = vmul.f32 %v3821_v45, %v5659_v14 }
 0x524   : > { %v2642_v56 = vld [vmem:[%s6255_s26 + $0x18] sm:$0xff]  ;;  %v2641_v57 = vld [vmem:[%s6255_s26 + $0x10] sm:$0xff]  ;;  %v2640_v58 = vld [vmem:[%s6255_s26 + $0x8] sm:$0xff] }
 0x525   : > { %v2639_v59 = vld [vmem:[%s6255_s26] sm:$0xff] }
 0x53b   : > { %v1805_v15 = vpop.f32.mrf.mxu0  ;;  %v1877_v16 = vpop.f32.mrf.mxu1 }
 0x53c   : > { %1810 = vst.msk [vmem:[%s6190_s10] sm:$0x3] %vm1809_vm11, %v1805_v15  ;;  %1881 = vst.msk [vmem:[%s6192_s7] sm:$0x3] %vm1809_vm11, %v1877_v16  ;;  %s6260_s10 = sld [smem:[#allocation33_spill]] }
 0x53d   : > { %v4329_v17 = vpop.f32.mrf.mxu0  ;;  %v4364_v18 = vpop.f32.mrf.mxu1  ;;  %s6262_s7 = sld [smem:[#allocation35_spill]] }
 0x542   : > { %v3827_v17 = vld [vmem:[%s6260_s10] ss:$0 sm:$0xff]  ;;  %s6267_s10 = sld [smem:[#allocation37_spill]] }
 0x55d   : > { %v1948_v19 = vpop.f32.mrf.mxu0  ;;  %v2019_v20 = vpop.f32.mrf.mxu1 }
 0x55e   : > { %v2023_v21 = vmul.f32 0.25, %v2019_v20  ;;  %v1952_v32 = vmul.f32 0.25, %v1948_v19  ;;  %v3828_v19 = vld [vmem:[%s6261_s18] ss:$0 sm:$0xff] }
 0x55f   : > { %v4399_v24 = vpop.f32.mrf.mxu0  ;;  %v4434_v25 = vpop.f32.mrf.mxu1 }
 0x560   : > { %4444 = vmatmul.mubr.msk.f32.vlgmr.msra.gmra.mxu0 %vm2034_vm12, %v2023_v21  ;;  %4477 = vmatmul.mubr.msk.f32.vlgmr.msra.gmra.mxu1 %vm2034_vm12, %v2023_v21  ;;  %v2442_v21 = vmul.f32 %v3827_v17, %v5659_v14  ;;  %v2451_v25 = vmul.f32 %v3828_v19, %v2025_v46  ;;  %v2725_v14 = vld [vmem:[%s6263_s1 + $0x10] sm:$0xff]  ;;  %v5899_v19 = vld [vmem:[%s6264_s8 + $0x8] sm:$0xff] }
 0x561   : > { %4447 = vmatpush3.msra.mxu0 %v2029_v22  ;;  %4454 = vmatprep.mubr.msk.f32.mxu0 %vm4880_vm2, %v4879_v6  ;;  %v5825_v46 = vld [vmem:[%s6264_s8 + $0x50] sm:$0xff] }
 0x562   : > { %4448 = vmatprep.subr.mxu0 %v4879_v6  ;;  %4491 = vmatpush3.msra.mxu1 %v2457_v26  ;;  %v5892_v17 = vld [vmem:[%s6264_s8 + $0x10] sm:$0xff] }
 0x563   : > { %4449 = vmatpush3.msra.mxu0 %v2028_v27  ;;  %4492 = vmatprep.subr.mxu1 %v4879_v6  ;;  %v3830_v27 = vld [vmem:[%s6262_s7] ss:$0 sm:$0xff]  ;;  %s6265_s7 = sld [smem:[#allocation26_spill]] }
 0x564   : > { %4450 = vmatprep.subr.mxu0 %v4879_v6  ;;  %4493 = vmatpush3.msra.mxu1 %v2456_v28 }
 0x565   : > { %4451 = vmatpush3.msra.mxu0 %v2027_v29  ;;  %4494 = vmatprep.subr.mxu1 %v4879_v6 }
 0x566   : > { %4452 = vmatprep.subr.mxu0 %v4879_v6  ;;  %4495 = vmatpush3.msra.mxu1 %v2455_v30  ;;  %v2726_v30 = vld [vmem:[%s6263_s1 + $0x18] sm:$0xff] }
 0x567   : > { %4453 = vmatpush3.msra.mxu0 %v2026_v31  ;;  %4496 = vmatprep.subr.mxu1 %v4879_v6 }
 0x568   : > { %4455 = vmatmul.mubr.msk.f32.vlgmr.msra.gmra.mxu0 %vm2034_vm12, %v1952_v32  ;;  %4457 = vmatprep.subr.mxu0 %v4879_v6 }
 0x569   : > { %4458 = vmatpush3.msra.mxu0 %v2203_v33  ;;  %4465 = vmatprep.mubr.msk.f32.mxu0 %vm4880_vm2, %v4879_v6  ;;  %v2723_v33 = vld [vmem:[%s6263_s1] sm:$0xff]  ;;  %s6266_s18 = smov %s6265_s7  ;;  %v3017_v63 = vld [vmem:[%s6265_s7 + $0x8] sm:$0xff]  ;;  %s6270_s7 = sld [smem:[#allocation43_spill]] }
 0x56a   : > { %4459 = vmatprep.subr.mxu0 %v4879_v6  ;;  %4497 = vmatpush3.msra.mxu1 %v2454_v34  ;;  %v2819_v34 = vld [vmem:[%s6256_s23 + $0x78] sm:$0xff]  ;;  %v5821_v45 = vld [vmem:[%s6266_s18] sm:$0xff] }
 0x56b   : > { %4460 = vmatpush3.msra.mxu0 %v2202_v35  ;;  %4498 = vmatprep.mubr.msk.f32.mxu1 %vm4880_vm2, %v4879_v6  ;;  %v2816_v35 = vld [vmem:[%s6256_s23 + $0x60] sm:$0xff] }
 0x56c   : > { %4461 = vmatprep.subr.mxu0 %v4879_v6  ;;  %4499 = vmatmul.mubr.msk.f32.vlgmr.msra.gmra.mxu1 %vm2034_vm12, %v2453_v36  ;;  %v2818_v36 = vld [vmem:[%s6256_s23 + $0x70] sm:$0xff] }
 0x56d   : > { %4462 = vmatpush3.msra.mxu0 %v2201_v37  ;;  %4501 = vmatprep.subr.mxu1 %v4879_v6 }
 0x56e   : > { %4463 = vmatprep.subr.mxu0 %v4879_v6  ;;  %4509 = vmatprep.mubr.msk.f32.mxu1 %vm4880_vm2, %v4879_v6 }
 0x56f   : > { %4464 = vmatpush3.msra.mxu0 %v2200_v38  ;;  %4502 = vmatpush3.msra.mxu1 %v2642_v56  ;;  %v2813_v38 = vld [vmem:[%s6256_s23 + $0x48] sm:$0xff]  ;;  %v5787_v56 = vld [vmem:[%s6264_s8 + $0xf0] sm:$0xff] }
 0x570   : > { %4466 = vmatmul.mubr.msk.f32.vlgmr.msra.gmra.mxu0 %vm2034_vm12, %v2199_v39  ;;  %4479 = vmatprep.subr.mxu0 %v4879_v6  ;;  %v2815_v39 = vld [vmem:[%s6256_s23 + $0x58] sm:$0xff] }
 0x571   : > { %4480 = vmatpush3.msra.mxu0 %v2290_v40  ;;  %4487 = vmatprep.mubr.msk.f32.mxu0 %vm4880_vm2, %v4879_v6  ;;  %v2812_v40 = vld [vmem:[%s6256_s23 + $0x40] sm:$0xff] }
 0x572   : > { %4481 = vmatprep.subr.mxu0 %v4879_v6  ;;  %4503 = vmatprep.subr.mxu1 %v4879_v6 }
 0x573   : > { %4482 = vmatpush3.msra.mxu0 %v2289_v41  ;;  %4504 = vmatpush3.msra.mxu1 %v2641_v57  ;;  %v2814_v41 = vld [vmem:[%s6256_s23 + $0x50] sm:$0xff] }
 0x574   : > { %4483 = vmatprep.subr.mxu0 %v4879_v6  ;;  %4505 = vmatprep.subr.mxu1 %v4879_v6  ;;  %v5791_v57 = vld [vmem:[%s6264_s8 + $0x70] sm:$0xff] }
 0x575   : > { %4484 = vmatpush3.msra.mxu0 %v2288_v42  ;;  %4506 = vmatpush3.msra.mxu1 %v2640_v58  ;;  %v2809_v42 = vld [vmem:[%s6256_s23 + $0x28] sm:$0xff] }
 0x576   : > { %4485 = vmatprep.subr.mxu0 %v4879_v6  ;;  %4507 = vmatprep.subr.mxu1 %v4879_v6  ;;  %v5795_v58 = vld [vmem:[%s6264_s8 + $0xe8] sm:$0xff] }
 0x577   : > { %4486 = vmatpush3.msra.mxu0 %v2287_v43  ;;  %4508 = vmatpush3.msra.mxu1 %v2639_v59  ;;  %v2811_v43 = vld [vmem:[%s6256_s23 + $0x38] sm:$0xff]  ;;  %v5799_v59 = vld [vmem:[%s6264_s8 + $0x68] sm:$0xff] }
 0x578   : > { %4488 = vmatmul.mubr.msk.f32.vlgmr.msra.gmra.mxu0 %vm2034_vm12, %v1952_v32  ;;  %2590 = vmatprep.subr.mxu0 %v2550_v44  ;;  %v2724_v32 = vld [vmem:[%s6263_s1 + $0x8] sm:$0xff]  ;;  %v2808_v44 = vld [vmem:[%s6256_s23 + $0x20] sm:$0xff] }
 0x579   : > { %2630 = vmatprep.mubr.f32.mxu0 %v4879_v6  ;;  %2591 = vmatpush1.msra.mxu0 %v2549_v47  ;;  %v2810_v47 = vld [vmem:[%s6256_s23 + $0x30] sm:$0xff] }
 0x57a   : > { %2592 = vmatprep.subr.mxu0 %v2548_v48  ;;  %2866 = vmatprep.subr.mxu1 %v2817_v60  ;;  %v2805_v48 = vld [vmem:[%s6256_s23 + $0x8] sm:$0xff]  ;;  %v5802_v60 = vld [vmem:[%s6264_s8 + $0xe0] sm:$0xff] }
 0x57b   : > { %2593 = vmatpush1.msra.mxu0 %v2547_v49  ;;  %v2807_v49 = vld [vmem:[%s6256_s23 + $0x18] sm:$0xff] }
 0x57c   : > { %2594 = vmatprep.subr.mxu0 %v2546_v50  ;;  %v2804_v50 = vld [vmem:[%s6256_s23] sm:$0xff] }
 0x57d   : > { %2595 = vmatpush1.msra.mxu0 %v2545_v53  ;;  %v2806_v53 = vld [vmem:[%s6256_s23 + $0x10] sm:$0xff] }
 0x57e   : > { %2596 = vmatprep.subr.mxu0 %v2544_v54  ;;  %v5775_v54 = vld [vmem:[%s6264_s8 + $0xf8] sm:$0xff] }
 0x57f   : > { %2597 = vmatpush1.msra.mxu0 %v2543_v55  ;;  %v5783_v55 = vld [vmem:[%s6264_s8 + $0x78] sm:$0xff] }
 0x580   : > { %4512 = vmatprep.subr.mxu0 %v4879_v6 }
 0x620   : > { %v2104_v61 = vpop.f32.mrf.mxu0  ;;  %v2361_v62 = vpop.f32.mrf.mxu1 }
 0x622   : > { %v4445_v51 = vpop.f32.mrf.mxu0  ;;  %v4478_v52 = vpop.f32.mrf.mxu1 }
 0x623   : > { %v5813_v51 = vld [vmem:[%s6264_s8 + $0x58] sm:$0xff]  ;;  %v5817_v52 = vld [vmem:[%s6264_s8 + $0xd0] sm:$0xff] }
 0x628   : > { %v2177_v0 = vpop.f32.mrf.mxu0 }
 0x629   : > { %v2178_v2 = vadd.f32 %v2177_v0, %v2104_v61  ;;  %v5805_v61 = vld [vmem:[%s6264_s8 + $0x60] sm:$0xff]  ;;  %v5829_v0 = vld [vmem:[%s6264_s8 + $0xc8] sm:$0xff] }
 0x62a   : > { %v4456_v5 = vpop.f32.mrf.mxu0 }
 0x62b   : > { %v2189_v7 = vadd.f32 %v2188_v4, %v2178_v2  ;;  %v5838_v2 = vld [vmem:[%s6264_s8 + $0xc0] sm:$0xff]  ;;  %v5847_v5 = vld [vmem:[%s6264_s8 + $0xb8] sm:$0xff] }
 0x62c   : > { %v2527_v9 = vpop.f32.mrf.mxu1  ;;  %v5844_v4 = vld [vmem:[%s6264_s8 + $0x40] sm:$0xff] }
 0x62d   : > { %v2198_v10 = vadd.f32 %v2197_v8, %v2189_v7  ;;  %v5851_v7 = vld [vmem:[%s6264_s8 + $0x38] sm:$0xff]  ;;  %v5854_v8 = vld [vmem:[%s6264_s8 + $0xb0] sm:$0xff] }
 0x62e   : > { %v4500_v11 = vpop.f32.mrf.mxu1 }
 0x62f   : > { %v5866_v11 = vld [vmem:[%s6264_s8 + $0x28] sm:$0xff] }
 0x630   : > { %v2273_v12 = vpop.f32.mrf.mxu0 }
 0x631   : > { %v2277_v15 = vadd.f32 %v2273_v12, %v2198_v10  ;;  %v5862_v10 = vld [vmem:[%s6264_s8 + $0xa8] sm:$0xff]  ;;  %v5872_v12 = vld [vmem:[%s6264_s8 + $0xa0] sm:$0xff] }
 0x632   : > { %v4467_v23 = vpop.f32.mrf.mxu0 }
 0x633   : > { %v2285_v16 = vadd.f32 %v3824_v13, %v2277_v15  ;;  %v5876_v13 = vld [vmem:[%s6264_s8 + $0x20] sm:$0xff]  ;;  %v5880_v15 = vld [vmem:[%s6264_s8 + $0x98] sm:$0xff] }
 0x634   : > { %v5884_v23 = vld [vmem:[%s6264_s8 + $0x18] sm:$0xff] }
 0x635   : > { %4631 = vtanh.f32 %v2285_v16  ;;  %v5888_v16 = vld [vmem:[%s6264_s8 + $0x90] sm:$0xff] }
 0x638   : > { %v2431_v18 = vpop.f32.mrf.mxu0 }
 0x639   : > { %v2432_v20 = vadd.f32 %v2431_v18, %v2361_v62  ;;  %v5809_v62 = vld [vmem:[%s6264_s8 + $0xd8] sm:$0xff]  ;;  %v5896_v18 = vld [vmem:[%s6264_s8 + $0x88] sm:$0xff] }
 0x63a   : > { %v4489_v22 = vpop.f32.mrf.mxu0 }
 0x63b   : > { %v2443_v24 = vadd.f32 %v2442_v21, %v2432_v20  ;;  %v5902_v20 = vld [vmem:[%s6264_s8 + $0x80] sm:$0xff]  ;;  %v2554_v22 = vshrl.u32 %v1534_v3, 7 }
 0x63c   : > { %v5906_v21 = vld [vmem:[%s6264_s8] sm:$0xff] }
 0x63d   : > { %v2452_v26 = vadd.f32 %v2451_v25, %v2443_v24  ;;  %v2555_v24 = vsub.s32 0, %v2554_v22  ;;  %v2551_v25 = vld [vmem:[%s6267_s10] sm:$0x3]  ;;  %s6271_s10 = sld [smem:[#allocation45_spill]] }
 0x63f   : > { %v2531_v28 = vadd.f32 %v2527_v9, %v2452_v26  ;;  %v5859_v9 = vld [vmem:[%s6264_s8 + $0x30] sm:$0xff]  ;;  %v2559_v26 = vsub.s32 1, %v2554_v22 }
 0x641   : > { %v2539_v29 = vadd.f32 %v3830_v27, %v2531_v28  ;;  %v2556_v27 = vrot.slane %v2551_v25, %v2555_v24  ;;  %v2560_v28 = vrot.slane %v2551_v25, %v2559_v26 }
 0x642   : > { %v4632_v31 = vpop.eup %4631 }
 0x643   : > { %2541 = vst.msk [vmem:[#allocation4] sm:$0x3] %vm1809_vm11, %v4632_v31  ;;  %4633 = vtanh.f32 %v2539_v29  ;;  %3831 = vmatmul.mubr.msk.f32.vlgmr.msra.gmra.mxu0 %vm2034_vm12, %v4632_v31  ;;  %s6272_s1 = smov %s6271_s10 }
 0x644   : > { %4513 = vmatpush3.msra.mxu0 %v2726_v30  ;;  %4520 = vmatprep.mubr.msk.f32.mxu0 %vm4880_vm2, %v4879_v6 }
 0x645   : > { %4514 = vmatprep.subr.mxu0 %v4879_v6 }
 0x646   : > { %4515 = vmatpush3.msra.mxu0 %v2725_v14 }
 0x647   : > { %4516 = vmatprep.subr.mxu0 %v4879_v6 }
 0x648   : > { %4517 = vmatpush3.msra.mxu0 %v2724_v32  ;;  %v3832_v32 = vld [vmem:[%s6268_s15] ss:$0 sm:$0xff]  ;;  %s6273_s15 = sld [smem:[#allocation47_spill]] }
 0x649   : > { %4518 = vmatprep.subr.mxu0 %v4879_v6 }
 0x64a   : > { %4519 = vmatpush3.msra.mxu0 %v2723_v33 }
 0x64b   : > { %2937 = vmatprep.subr.mxu0 %v2819_v34 }
 0x64e   : > { %s6274_s3 = smov %s6273_s15 }
 0x650   : > { %v4634_v37 = vpop.eup %4633 }
 0x651   : > { %2542 = vst.msk [vmem:[#allocation5] sm:$0x3] %vm1809_vm11, %v4634_v37  ;;  %4510 = vmatmul.mubr.msk.f32.vlgmr.msra.gmra.mxu1 %vm2034_vm12, %v4634_v37  ;;  %4521 = vmatmul.mubr.msk.f32.vlgmr.msra.gmra.mxu0 %vm2034_vm12, %v4634_v37 }
 0x652   : > { %2867 = vmatpush1.msra.mxu1 %v2816_v35  ;;  %2938 = vmatpush1.msra.mxu0 %v2818_v36  ;;  %v3834_v36 = vld [vmem:[%s6269_s11] ss:$0 sm:$0xff]  ;;  %s3405_s11 = sand.u32 1, %s5103_s0  }
 0x653   : > { %2868 = vmatprep.subr.mxu1 %v2813_v38  ;;  %2939 = vmatprep.subr.mxu0 %v2815_v39  ;;  %v2832_v38 = vsub.s32 2, %v2554_v22  ;;  %v2820_v39 = vld [vmem:[%s6270_s7] sm:$0xf]  ;;  %s6008_s7 = sshll.u32 %s5103_s0, 5  ;;  %s6022_s9 = scalar_lea.sflag [#allocation9], %s3405_s11 }
 0x654   : > { %2869 = vmatpush1.msra.mxu1 %v2812_v40  ;;  %2940 = vmatpush1.msra.mxu0 %v2814_v41  ;;  %v2836_v40 = vsub.s32 3, %v2554_v22  ;;  %s6012_s4 = scalar_lea.hbm %s6271_s10, %s6008_s7  ;;  %s6018_s8 = scalar_lea.hbm %s6273_s15, %s6008_s7 }
 0x655   : > { %2870 = vmatprep.subr.mxu1 %v2809_v42  ;;  %2941 = vmatprep.subr.mxu0 %v2811_v43  ;;  %v2825_v42 = vrot.slane %v2820_v39, %v2555_v24  ;;  %v2833_v43 = vrot.slane %v2820_v39, %v2832_v38 }
 0x656   : > { %2871 = vmatpush1.msra.mxu1 %v2808_v44  ;;  %2942 = vmatpush1.msra.mxu0 %v2810_v47  ;;  %v2829_v44 = vrot.slane %v2820_v39, %v2559_v26  ;;  %v2837_v47 = vrot.slane %v2820_v39, %v2836_v40 }
 0x657   : > { %2872 = vmatprep.subr.mxu1 %v2805_v48  ;;  %2943 = vmatprep.subr.mxu0 %v2807_v49 }
 0x658   : > { %2873 = vmatpush1.msra.mxu1 %v2804_v50  ;;  %2906 = vmatprep.mubr.f32.mxu1 %v4879_v6 }
 0x659   : > { %2944 = vmatpush1.msra.mxu0 %v2806_v53  ;;  %2977 = vmatprep.mubr.f32.mxu0 %v4879_v6 }
 0x65a   : > { %3836 = vmatmul.mubr.msk.f32.vlgmr.msra.gmra.mxu1 %vm2034_vm12, %v4634_v37  ;;  %3837 = vmatmul.mubr.msk.f32.vlgmr.msra.gmra.mxu0 %vm2034_vm12, %v4634_v37 }
 0x65b   : > { %4036 = vmatprep.subr.mxu1 %v5775_v54  ;;  %3163 = vmatprep.mubr.f32.mxu0 %v4879_v6 }
 0x65c   : > { %4037 = vmatpush3.msra.mxu1 %v5783_v55  ;;  %3129 = vmatprep.subr.mxu0 %v3017_v63 }
 0x65d   : > { %4038 = vmatprep.subr.mxu1 %v5787_v56  ;;  %3130 = vmatpush1.msra.mxu0 %v5821_v45 }
 0x65e   : > { %4039 = vmatpush3.msra.mxu1 %v5791_v57  ;;  %3203 = vmatprep.subr.mxu0 %v3017_v63 }
 0x65f   : > { %4040 = vmatprep.subr.mxu1 %v5795_v58 }
 0x660   : > { %4041 = vmatpush3.msra.mxu1 %v5799_v59 }
 0x661   : > { %4042 = vmatprep.subr.mxu1 %v5802_v60 }
 0x662   : > { %4043 = vmatpush3.msra.mxu1 %v5805_v61 }
 0x663   : > { %4044 = vmatprep.subr.mxu1 %v5809_v62 }
 0x664   : > { %4045 = vmatpush3.msra.mxu1 %v5813_v51 }
 0x665   : > { %4046 = vmatprep.subr.mxu1 %v5817_v52 }
 0x666   : > { %4047 = vmatpush3.msra.mxu1 %v5825_v46 }
 0x667   : > { %4048 = vmatprep.subr.mxu1 %v5829_v0 }
 0x668   : > { %4049 = vmatpush3.msra.mxu1 %v5834_v1 }
 0x669   : > { %4050 = vmatprep.subr.mxu1 %v5838_v2 }
 0x66a   : > { %4051 = vmatpush3.msra.mxu1 %v5844_v4 }
 0x66b   : > { %4052 = vmatprep.subr.mxu1 %v5847_v5 }
 0x66c   : > { %4053 = vmatpush3.msra.mxu1 %v5851_v7 }
 0x66d   : > { %4054 = vmatprep.subr.mxu1 %v5854_v8 }
 0x66e   : > { %4055 = vmatpush3.msra.mxu1 %v5859_v9 }
 0x66f   : > { %4056 = vmatprep.subr.mxu1 %v5862_v10 }
 0x670   : > { %4057 = vmatpush3.msra.mxu1 %v5866_v11 }
 0x671   : > { %4058 = vmatprep.subr.mxu1 %v5872_v12 }
 0x672   : > { %4059 = vmatpush3.msra.mxu1 %v5876_v13 }
 0x673   : > { %4060 = vmatprep.subr.mxu1 %v5880_v15 }
 0x674   : > { %4061 = vmatpush3.msra.mxu1 %v5884_v23 }
 0x675   : > { %4062 = vmatprep.subr.mxu1 %v5888_v16 }
 0x676   : > { %4063 = vmatpush3.msra.mxu1 %v5892_v17 }
 0x677   : > { %4064 = vmatprep.subr.mxu1 %v5896_v18 }
 0x678   : > { %4065 = vmatpush3.msra.mxu1 %v5899_v19 }
 0x679   : > { %4066 = vmatprep.subr.mxu1 %v5902_v20 }
 0x67a   : > { %4067 = vmatpush3.msra.mxu1 %v5906_v21 }
 0x67b   : > { %4106 = vmatprep.subr.mxu1 %v5775_v54 }
 0x703   : > { %v2632_v29 = vpop.f32.mrf.mxu0 }
 0x704   : > { %v2633_v30 = vadd.f32 %v2632_v29, %v2556_v27 }
 0x705   : > { %v2634_v31 = vpop.f32.mrf.mxu0 }
 0x706   : > { %2637 = vst [vmem:[#allocation2] sm:$0x3] %v2633_v30  ;;  %v2635_v14 = vadd.f32 %v2634_v31, %v2560_v28 }
 0x708   : > { %2638 = vst [vmem:[#allocation3] sm:$0x3] %v2635_v14 }
 0x711   : > { %v2719_v33 = vpop.f32.mrf.mxu1  ;;  %v2800_v34 = vpop.f32.mrf.mxu0 }
 0x712   : > { %v2720_v35 = vadd.f32 %v3832_v32, %v2719_v33  ;;  %v2801_v41 = vadd.f32 %v3834_v36, %v2800_v34 }
 0x713   : > { %v4511_v3 = vpop.f32.mrf.mxu1  ;;  %v4522_v37 = vpop.f32.mrf.mxu0 }
 0x714   : > { %3838 = vmatmul.mubr.msk.f32.vlgmr.msra.gmra.mxu0 %vm3095_vm13, %v2720_v35 }
 0x715   : > { %3204 = vmatpush1.msra.mxu0 %v5821_v45  ;;  %3237 = vmatprep.mubr.f32.mxu0 %v4879_v6 }
 0x716   : > { %4071 = vmatprep.subr.mxu0 %v5775_v54 }
 0x718   : > { %3839 = vmatmul.mubr.msk.f32.vlgmr.msra.gmra.mxu0 %vm3095_vm13, %v2801_v41 }
 0x719   : > { %4072 = vmatpush3.msra.mxu0 %v5783_v55 }
 0x71a   : > { %v2908_v48 = vpop.f32.mrf.mxu1  ;;  %v2979_v49 = vpop.f32.mrf.mxu0  ;;  %4073 = vmatprep.subr.mxu0 %v5787_v56 }
 0x71b   : > { %v5922_v50 = vadd.f32 %v2908_v48, %v2825_v42  ;;  %v5924_v53 = vadd.f32 %v2979_v49, %v2833_v43  ;;  %4074 = vmatpush3.msra.mxu0 %v5791_v57 }
 0x71c   : > { %v2910_v6 = vpop.f32.mrf.mxu1  ;;  %v2981_v63 = vpop.f32.mrf.mxu0  ;;  %4075 = vmatprep.subr.mxu0 %v5795_v58 }
 0x71d   : > { %v5928_v54 = vadd.f32 %v2910_v6, %v2829_v44  ;;  %v5930_v45 = vadd.f32 %v2981_v63, %v2837_v47  ;;  %4076 = vmatpush3.msra.mxu0 %v5799_v59  ;;  %v3018_v22 = vmul.f32 %v5922_v50, %v5922_v50  ;;  %v3020_v24 = vmul.f32 %v5924_v53, %v5924_v53 }
 0x71e   : > { %4077 = vmatprep.subr.mxu0 %v5802_v60 }
 0x71f   : > { %v3019_v25 = vmul.f32 %v5928_v54, %v5928_v54  ;;  %v3021_v26 = vmul.f32 %v5930_v45, %v5930_v45  ;;  %4078 = vmatpush3.msra.mxu0 %v5805_v61  ;;  %v3022_v28 = vadd.f32 %v3020_v24, %v3018_v22 }
 0x720   : > { %4079 = vmatprep.subr.mxu0 %v5809_v62 }
 0x721   : > { %v3023_v27 = vadd.f32 %v3021_v26, %v3019_v25  ;;  %4080 = vmatpush3.msra.mxu0 %v5813_v51 }
 0x722   : > { %4081 = vmatprep.subr.mxu0 %v5817_v52 }
 0x723   : > { %3088 = vmatprep.mubr.f32.mxu1 %v3023_v27  ;;  %4082 = vmatpush3.msra.mxu0 %v5825_v46 }
 0x724   : > { %3089 = vmatmul.mubr.f32.vlgmr.msra.gmra.mxu1 %v3022_v28  ;;  %4083 = vmatprep.subr.mxu0 %v5829_v0 }
 0x725   : > { %4107 = vmatpush3.msra.mxu1 %v5783_v55  ;;  %4084 = vmatpush3.msra.mxu0 %v5834_v1 }
 0x726   : > { %4108 = vmatprep.subr.mxu1 %v5787_v56  ;;  %4085 = vmatprep.subr.mxu0 %v5838_v2 }
 0x727   : > { %4109 = vmatpush3.msra.mxu1 %v5791_v57  ;;  %4086 = vmatpush3.msra.mxu0 %v5844_v4 }
 0x728   : > { %4110 = vmatprep.subr.mxu1 %v5795_v58  ;;  %4087 = vmatprep.subr.mxu0 %v5847_v5 }
 0x729   : > { %4111 = vmatpush3.msra.mxu1 %v5799_v59  ;;  %4088 = vmatpush3.msra.mxu0 %v5851_v7 }
 0x72a   : > { %4112 = vmatprep.subr.mxu1 %v5802_v60  ;;  %4089 = vmatprep.subr.mxu0 %v5854_v8 }
 0x72b   : > { %4113 = vmatpush3.msra.mxu1 %v5805_v61  ;;  %4090 = vmatpush3.msra.mxu0 %v5859_v9 }
 0x72c   : > { %4114 = vmatprep.subr.mxu1 %v5809_v62  ;;  %4091 = vmatprep.subr.mxu0 %v5862_v10 }
 0x72d   : > { %4115 = vmatpush3.msra.mxu1 %v5813_v51  ;;  %4092 = vmatpush3.msra.mxu0 %v5866_v11 }
 0x72e   : > { %4116 = vmatprep.subr.mxu1 %v5817_v52  ;;  %4093 = vmatprep.subr.mxu0 %v5872_v12 }
 0x72f   : > { %4117 = vmatpush3.msra.mxu1 %v5825_v46  ;;  %4094 = vmatpush3.msra.mxu0 %v5876_v13 }
 0x730   : > { %4118 = vmatprep.subr.mxu1 %v5829_v0  ;;  %4095 = vmatprep.subr.mxu0 %v5880_v15 }
 0x731   : > { %4119 = vmatpush3.msra.mxu1 %v5834_v1  ;;  %4096 = vmatpush3.msra.mxu0 %v5884_v23 }
 0x732   : > { %4120 = vmatprep.subr.mxu1 %v5838_v2  ;;  %4097 = vmatprep.subr.mxu0 %v5888_v16 }
 0x733   : > { %4121 = vmatpush3.msra.mxu1 %v5844_v4  ;;  %4098 = vmatpush3.msra.mxu0 %v5892_v17 }
 0x734   : > { %4122 = vmatprep.subr.mxu1 %v5847_v5  ;;  %4099 = vmatprep.subr.mxu0 %v5896_v18 }
 0x735   : > { %4123 = vmatpush3.msra.mxu1 %v5851_v7  ;;  %4100 = vmatpush3.msra.mxu0 %v5899_v19 }
 0x736   : > { %4124 = vmatprep.subr.mxu1 %v5854_v8  ;;  %4101 = vmatprep.subr.mxu0 %v5902_v20 }
 0x737   : > { %4125 = vmatpush3.msra.mxu1 %v5859_v9  ;;  %4102 = vmatpush3.msra.mxu0 %v5906_v21 }
 0x738   : > { %4126 = vmatprep.subr.mxu1 %v5862_v10 }
 0x739   : > { %4127 = vmatpush3.msra.mxu1 %v5866_v11 }
 0x73a   : > { %4128 = vmatprep.subr.mxu1 %v5872_v12 }
 0x73b   : > { %4129 = vmatpush3.msra.mxu1 %v5876_v13 }
 0x73c   : > { %4130 = vmatprep.subr.mxu1 %v5880_v15 }
 0x73d   : > { %4131 = vmatpush3.msra.mxu1 %v5884_v23 }
 0x73e   : > { %4132 = vmatprep.subr.mxu1 %v5888_v16 }
 0x73f   : > { %4133 = vmatpush3.msra.mxu1 %v5892_v17 }
 0x740   : > { %4134 = vmatprep.subr.mxu1 %v5896_v18 }
 0x741   : > { %4135 = vmatpush3.msra.mxu1 %v5899_v19 }
 0x742   : > { %4136 = vmatprep.subr.mxu1 %v5902_v20 }
 0x743   : > { %4137 = vmatpush3.msra.mxu1 %v5906_v21 }
 0x7d4   : > { %v3165_v55 = vpop.f32.mrf.mxu0 }
 0x7d5   : > { %v3244_v46 = vmul.f32 %v3165_v55, %v5922_v50  ;;  %v3324_v0 = vmul.f32 %v3165_v55, %v5924_v53 }
 0x7d6   : > { %v3167_v56 = vpop.f32.mrf.mxu0 }
 0x7d7   : > { %v3245_v61 = vmul.f32 %v3167_v56, %v5928_v54  ;;  %v3325_v62 = vmul.f32 %v3167_v56, %v5930_v45 }
 0x7d8   : > { %v3239_v57 = vpop.f32.mrf.mxu0 }
 0x7d9   : > { %v3246_v58 = vmul.f32 %v3239_v57, %v5924_v53  ;;  %v3322_v59 = vmul.f32 %v3239_v57, %v5922_v50 }
 0x7da   : > { %v3241_v60 = vpop.f32.mrf.mxu0 }
 0x7db   : > { %v3247_v51 = vmul.f32 %v3241_v60, %v5930_v45  ;;  %v3323_v52 = vmul.f32 %v3241_v60, %v5928_v54  ;;  %v3248_v4 = vsub.f32 %v3244_v46, %v3246_v58  ;;  %v3326_v5 = vadd.f32 %v3324_v0, %v3322_v59 }
 0x7dd   : > { %v3249_v1 = vsub.f32 %v3245_v61, %v3247_v51  ;;  %v3327_v2 = vadd.f32 %v3325_v62, %v3323_v52 }
 0x7df   : > { %3314 = vmatprep.mubr.f32.mxu0 %v3249_v1  ;;  %3392 = vmatprep.mubr.f32.mxu1 %v3327_v2 }
 0x7e0   : > { %3315 = vmatmul.mubr.f32.vlgmr.msra.gmra.mxu0 %v3248_v4  ;;  %3393 = vmatmul.mubr.f32.vlgmr.msra.gmra.mxu1 %v3326_v5 }
 0x7e1   : > { %4650 = shalt.err (!%p4647_p4)
}
 0x7e2   : > { %s4651_s5 = scalar_lea.hbm %s6012_s4, 32  ;;  %s4655_s10 = scalar_lea.hbm %s6272_s1, 96 }
 0x7e3   : > { %p4652_p7 = scmp.ne.s32.totalorder %s6012_s4, %s4651_s5  ;;  %p4656_p10 = scmp.lt.s32.totalorder %s6012_s4, %s6272_s1 }
 0x7e4   : > { %p4657_p11 = scmp.lt.s32.totalorder %s4655_s10, %s4651_s5 }
 0x7e5   : > { %p4653_p8 = pnand %p4652_p7, %p5122_p5 }
 0x7e6   : > { %p4658_p12 = por %p4657_p11, %p4656_p10 }
 0x7e7   : > { %p4654_p9 = pneg %p4653_p8 }
 0x7e9   : > { %p4659_p13 = pnand %p4658_p12, %p4654_p9 }
 0x7eb   : > { %4662 = shalt.err (!%p4659_p13)
}
 0x7ec   : > { %s6276_s13 = sld [smem:[#allocation44_spill]]  ;;  %s6277_s17 = scalar_lea.vmem [#allocation11], %s5136_s22 }
 0x7ed   : > { %4524 = dma.vmem_to_hbm [thread:$0]  (%p5122_p5), %s3461_s6, 32, %s6012_s4, %s6022_s9  }
 0x7ee   : > { %s3486_s12 = sshll.u32 %s6277_s17, 4  ;;  %s6045_s15 = scalar_lea.sflag [#allocation12], %s3405_s11  ;;  %s3487_s12 = int_to_ptr.vmem [resolvable:$true] %s3486_s12 }
 0x7ef   : > { %s4663_s5 = scalar_lea.vmem %s3487_s12, 32  ;;  %s4882_s10 = smov [#allocation11]  }
 0x7f0   : > { %p4664_p0 = scmp.ne.s32.totalorder %s3487_s12, %s4663_s5  ;;  %s4667_s1 = sshll.u32 %s4882_s10, 4  ;;  %s4668_s1 = int_to_ptr.vmem [resolvable:$false] %s4667_s1 }
 0x7f1   : > { %s4669_s18 = scalar_lea.vmem %s4668_s1, 64  ;;  %p4670_p3 = scmp.lt.s32.totalorder %s3487_s12, %s4668_s1 }
 0x7f2   : > { %s6041_s16 = scalar_lea.hbm %s6276_s13, %s6008_s7  ;;  %p4665_p1 = pnand %p4664_p0, %p5122_p5 }
 0x7f3   : > { %p4671_p4 = scmp.lt.s32.totalorder %s4669_s18, %s4663_s5 }
 0x7f4   : > { %p4666_p2 = pneg %p4665_p1 }
 0x7f5   : > { %p4672_p7 = por %p4671_p4, %p4670_p3 }
 0x7f7   : > { %p4673_p8 = pnand %p4672_p7, %p4666_p2 }
 0x7f9   : > { %4676 = shalt.err (!%p4673_p8)
}
 0x7fa   : > { %s4677_s6 = scalar_lea.hbm %s6018_s8, 32  ;;  %s4681_s4 = scalar_lea.hbm %s6274_s3, 96 }
 0x7fb   : > { %p4678_p9 = scmp.ne.s32.totalorder %s6018_s8, %s4677_s6  ;;  %p4682_p12 = scmp.lt.s32.totalorder %s6018_s8, %s6274_s3 }
 0x7fc   : > { %p4683_p13 = scmp.lt.s32.totalorder %s4681_s4, %s4677_s6 }
 0x7fd   : > { %p4679_p10 = pnand %p4678_p9, %p5122_p5 }
 0x7fe   : > { %p4684_p0 = por %p4683_p13, %p4682_p12 }
 0x7ff   : > { %p4680_p11 = pneg %p4679_p10 }
 0x801   : > { %p4685_p1 = pnand %p4684_p0, %p4680_p11 }
 0x803   : > { %4688 = shalt.err (!%p4685_p1)
}
 0x804   : > { %s6278_s0 = sld [smem:[#allocation46_spill]]  ;;  %s6279_s1 = scalar_lea.vmem [#allocation6], %s5136_s22 }
 0x805   : > { %4526 = dma.vmem_to_hbm [thread:$0]  (%p5122_p5), %s3487_s12, 32, %s6018_s8, %s6045_s15  }
 0x806   : > { %s3447_s18 = sshll.u32 %s6279_s1, 4  ;;  %s6280_s17 = scalar_lea.vmem [#allocation10], %s5136_s22  ;;  %s3448_s18 = int_to_ptr.vmem [resolvable:$true] %s3447_s18 }
 0x807   : > { %s3473_s5 = sshll.u32 %s6280_s17, 4  ;;  %s3401_s10 = scalar_lea.sflag [#allocation7], %s5133_s2  ;;  %s3474_s5 = int_to_ptr.vmem [resolvable:$true] %s3473_s5 }
 0x808   : > { %s4689_s6 = scalar_lea.vmem %s3448_s18, 32  ;;  %s4883_s4 = smov [#allocation6]  }
 0x809   : > { %p4690_p2 = scmp.ne.s32.totalorder %s3448_s18, %s4689_s6  ;;  %s4693_s3 = sshll.u32 %s4883_s4, 4  ;;  %s4694_s3 = int_to_ptr.vmem [resolvable:$false] %s4693_s3 }
 0x80a   : > { %s6064_s11 = scalar_lea.hbm %s6278_s0, %s6008_s7  ;;  %s4695_s19 = scalar_lea.vmem %s4694_s3, 64 }
 0x80b   : > { %p4691_p3 = pnand %p4690_p2, %p5122_p5  ;;  %p4696_p7 = scmp.lt.s32.totalorder %s3448_s18, %s4694_s3 }
 0x80c   : > { %p4697_p8 = scmp.lt.s32.totalorder %s4695_s19, %s4689_s6 }
 0x80d   : > { %p4692_p4 = pneg %p4691_p3 }
 0x80e   : > { %p4698_p9 = por %p4697_p8, %p4696_p7 }
 0x810   : > { %p4699_p10 = pnand %p4698_p9, %p4692_p4 }
 0x812   : > { %4702 = shalt.err (!%p4699_p10)
}
 0x813   : > { %s4703_s8 = scalar_lea.hbm %s6041_s16, 32  ;;  %s4707_s12 = scalar_lea.hbm %s6276_s13, 96 }
 0x814   : > { %p4704_p11 = scmp.ne.s32.totalorder %s6041_s16, %s4703_s8  ;;  %p4708_p0 = scmp.lt.s32.totalorder %s6041_s16, %s6276_s13 }
 0x815   : > { %p4709_p1 = scmp.lt.s32.totalorder %s4707_s12, %s4703_s8 }
 0x816   : > { %p4705_p12 = pnand %p4704_p11, %p5122_p5 }
 0x817   : > { %p4710_p2 = por %p4709_p1, %p4708_p0 }
 0x818   : > { %p4706_p13 = pneg %p4705_p12 }
 0x81a   : > { %p4711_p3 = pnand %p4710_p2, %p4706_p13 }
 0x81c   : > { %4714 = shalt.err (!%p4711_p3)
}
 0x81d   : > { %4523 = dma.vmem_to_hbm [thread:$0]  (%p5122_p5), %s3448_s18, 32, %s6041_s16, %s3401_s10  }
 0x81e   : > { %s4715_s3 = scalar_lea.vmem %s3474_s5, 32  ;;  %s4884_s19 = smov [#allocation10]  }
 0x81f   : > { %p4716_p4 = scmp.ne.s32.totalorder %s3474_s5, %s4715_s3  ;;  %s4719_s1 = sshll.u32 %s4884_s19, 4  ;;  %s4720_s1 = int_to_ptr.vmem [resolvable:$false] %s4719_s1 }
 0x820   : > { %s4721_s17 = scalar_lea.vmem %s4720_s1, 64  ;;  %p4722_p9 = scmp.lt.s32.totalorder %s3474_s5, %s4720_s1 }
 0x821   : > { %p4717_p7 = pnand %p4716_p4, %p5122_p5  ;;  %p4723_p10 = scmp.lt.s32.totalorder %s4721_s17, %s4715_s3 }
 0x823   : > { %p4718_p8 = pneg %p4717_p7  ;;  %p4724_p11 = por %p4723_p10, %p4722_p9 }
 0x825   : > { %p4725_p12 = pnand %p4724_p11, %p4718_p8 }
 0x827   : > { %4728 = shalt.err (!%p4725_p12)
}
 0x828   : > { %s4729_s16 = scalar_lea.hbm %s6064_s11, 32  ;;  %s4733_s18 = scalar_lea.hbm %s6278_s0, 96 }
 0x829   : > { %p4730_p13 = scmp.ne.s32.totalorder %s6064_s11, %s4729_s16  ;;  %p4734_p2 = scmp.lt.s32.totalorder %s6064_s11, %s6278_s0 }
 0x82a   : > { %p4735_p3 = scmp.lt.s32.totalorder %s4733_s18, %s4729_s16 }
 0x82b   : > { %p4731_p0 = pnand %p4730_p13, %p5122_p5 }
 0x82c   : > { %p4736_p4 = por %p4735_p3, %p4734_p2 }
 0x82d   : > { %p4732_p1 = pneg %p4731_p0 }
 0x82f   : > { %p4737_p7 = pnand %p4736_p4, %p4732_p1 }
 0x831   : > { %4740 = shalt.err (!%p4737_p7)
}
 0x832   : > { %4525 = dma.vmem_to_hbm [thread:$0]  (%p5122_p5), %s3474_s5, 32, %s6064_s11, %s6022_s9   ;;  %v4068_v7 = vpop.f32.mrf.mxu1 }
 0x833   : > { %s6281_s10 = sld [smem:[#allocation48_spill]]  ;;  %s6283_s4 = scalar_lea.vmem [#allocation13], %s5136_s22 }
 0x834   : > { %v4069_v8 = vpop.f32.mrf.mxu1  ;;  %s3499_s8 = sshll.u32 %s6283_s4, 4  ;;  %s6284_s12 = scalar_lea.vmem [#allocation14], %s5136_s22  ;;  %s6102_s8 = int_to_ptr.vmem [resolvable:$true] %s3499_s8 }
 0x835   : > { %v4070_v9 = vadd.f32 %v4069_v8, %v4068_v7  ;;  %s3512_s3 = sshll.u32 %s6284_s12, 4  ;;  %s6100_s9 = scalar_lea.hbm %s5065_s14, %s6008_s7  ;;  %s6108_s3 = int_to_ptr.vmem [resolvable:$true] %s3512_s3 }
 0x836   : > { %s6285_s5 = smov %s6283_s4  ;;  %s6286_s19 = smov %s6284_s12 }
 0x837   : > { %4635 = vrsqrt.f32 %v4070_v9  ;;  %s4741_s1 = scalar_lea.vmem %s6102_s8, 32  ;;  %s4885_s17 = smov [#allocation13]  }
 0x838   : > { %p4742_p8 = scmp.ne.s32.totalorder %s6102_s8, %s4741_s1  ;;  %s4745_s16 = sshll.u32 %s4885_s17, 4  ;;  %s4746_s16 = int_to_ptr.vmem [resolvable:$false] %s4745_s16 }
 0x839   : > { %s6282_s6 = smov %s6281_s10  ;;  %s6106_s11 = scalar_lea.hbm %s6281_s10, %s6008_s7 }
 0x83a   : > { %p4743_p9 = pnand %p4742_p8, %p5122_p5  ;;  %s4747_s18 = scalar_lea.vmem %s4746_s16, 64 }
 0x83b   : > { %p4748_p11 = scmp.lt.s32.totalorder %s6102_s8, %s4746_s16  ;;  %p4749_p12 = scmp.lt.s32.totalorder %s4747_s18, %s4741_s1 }
 0x83c   : > { %p4744_p10 = pneg %p4743_p9 }
 0x83d   : > { %p4750_p13 = por %p4749_p12, %p4748_p11 }
 0x83f   : > { %p4751_p0 = pnand %p4750_p13, %p4744_p10 }
 0x844   : > { %v4636_v16 = vpop.eup %4635 }
 0x8a0   : > { %v4103_v10 = vpop.f32.mrf.mxu0  ;;  %v4138_v11 = vpop.f32.mrf.mxu1 }
 0x8a2   : > { %v4104_v12 = vpop.f32.mrf.mxu0  ;;  %v4139_v13 = vpop.f32.mrf.mxu1 }
 0x8a3   : > { %v4105_v15 = vadd.f32 %v4104_v12, %v4103_v10  ;;  %v4140_v23 = vadd.f32 %v4139_v13, %v4138_v11 }
 0x8a5   : > { %v3320_v17 = vmul.f32 %v4636_v16, %v4105_v15  ;;  %v3398_v18 = vmul.f32 %v4636_v16, %v4140_v23 }
 0x8a7   : > { %3321 = vst.msk [vmem:[%s6285_s5] sm:$0x3] %vm1809_vm11, %v3320_v17  ;;  %3399 = vst.msk [vmem:[%s6286_s19] sm:$0x3] %vm1809_vm11, %v3398_v18 }
 0x8a8   : > { %4754 = shalt.err (!%p4751_p0)
}
 0x8a9   : > { %s4755_s22 = scalar_lea.hbm %s6100_s9, 32  ;;  %s4759_s7 = scalar_lea.hbm %s5065_s14, 96 }
 0x8aa   : > { %p4756_p1 = scmp.ne.s32.totalorder %s6100_s9, %s4755_s22  ;;  %p4760_p4 = scmp.lt.s32.totalorder %s6100_s9, %s5065_s14 }
 0x8ab   : > { %p4761_p7 = scmp.lt.s32.totalorder %s4759_s7, %s4755_s22 }
 0x8ac   : > { %p4757_p2 = pnand %p4756_p1, %p5122_p5 }
 0x8ad   : > { %p4762_p8 = por %p4761_p7, %p4760_p4 }
 0x8ae   : > { %p4758_p3 = pneg %p4757_p2 }
 0x8b0   : > { %p4763_p9 = pnand %p4762_p8, %p4758_p3 }
 0x8b2   : > { %4766 = shalt.err (!%p4763_p9)
}
 0x8b3   : > { %4527 = dma.vmem_to_hbm [thread:$0]  (%p5122_p5), %s6102_s8, 32, %s6100_s9, %s6045_s15  }
 0x8b4   : > { %s3426_s10 = scalar_lea.sflag [#allocation15], %s5133_s2  ;;  %s4767_s4 = scalar_lea.vmem %s6108_s3, 32 }
 0x8b5   : > { %p4768_p10 = scmp.ne.s32.totalorder %s6108_s3, %s4767_s4  ;;  %s4886_s12 = smov [#allocation14]  }
 0x8b6   : > { %s4771_s5 = sshll.u32 %s4886_s12, 4  ;;  %s4772_s5 = int_to_ptr.vmem [resolvable:$false] %s4771_s5 }
 0x8b7   : > { %p4769_p11 = pnand %p4768_p10, %p5122_p5  ;;  %s4773_s19 = scalar_lea.vmem %s4772_s5, 64 }
 0x8b8   : > { %p4774_p13 = scmp.lt.s32.totalorder %s6108_s3, %s4772_s5  ;;  %p4775_p0 = scmp.lt.s32.totalorder %s4773_s19, %s4767_s4 }
 0x8b9   : > { %p4770_p12 = pneg %p4769_p11 }
 0x8ba   : > { %p4776_p1 = por %p4775_p0, %p4774_p13 }
 0x8bc   : > { %p4777_p2 = pnand %p4776_p1, %p4770_p12 }
 0x8be   : > { %4780 = shalt.err (!%p4777_p2)
}
 0x8bf   : > { %s4781_s2 = scalar_lea.hbm %s6106_s11, 32  ;;  %s4785_s15 = scalar_lea.hbm %s6282_s6, 96 }
 0x8c0   : > { %p4782_p3 = scmp.ne.s32.totalorder %s6106_s11, %s4781_s2  ;;  %p4786_p8 = scmp.lt.s32.totalorder %s6106_s11, %s6282_s6 }
 0x8c1   : > { %p4787_p9 = scmp.lt.s32.totalorder %s4785_s15, %s4781_s2 }
 0x8c2   : > { %p4783_p4 = pnand %p4782_p3, %p5122_p5 }
 0x8c3   : > { %p4788_p10 = por %p4787_p9, %p4786_p8 }
 0x8c4   : > { %p4784_p7 = pneg %p4783_p4 }
 0x8c6   : > { %p4789_p11 = pnand %p4788_p10, %p4784_p7 }
 0x8c8   : > { %4792 = shalt.err (!%p4789_p11)
}
 0x8c9   : > { %4528 = dma.vmem_to_hbm [thread:$0]  (%p5122_p5), %s6108_s3, 32, %s6106_s11, %s3426_s10  }
 0x8ca PF: > { %s6287_s8 = sld [smem:[#allocation53_spill]] }
 0x8cb   : > { %s6288_s9 = sld [smem:[#allocation50_spill]] }
 0x8d0   : > { %p4554_p12 = scmp.ge.s32.totalorder %s6287_s8, 2 }
 0x8d1   : > { %s3530_s17 = sand.u32 1, %s6288_s9  }
 0x8d2   : > { %p4536_p13 = pnand %p4554_p12, %p5126_p6  ;;  %s3531_s16 = scalar_lea.sflag [#allocation7], %s3530_s17 }
 0x8d4   : > { %p4537_p0 = pneg %p4536_p13 }
 0x8d6   : > { %4810 = dma.done.wait (%p4537_p0), %s3531_s16, 32  }
 0x8d7   : > { %4812 = vsyncadd (%p4537_p0), %s3531_s16, 4294967264  ;;  %s6290_s18 = sadd.s32 4294967294, %s6287_s8  }
 0x8d8   : > { %s3539_s22 = sand.u32 1, %s6290_s18  }
 0x8d9   : > { %s3540_s7 = scalar_lea.sflag [#allocation9], %s3539_s22 }
 0x8da   : > { %4814 = dma.done.wait (%p4537_p0), %s3540_s7, 64  }
 0x8db   : > { %4816 = vsyncadd (%p4537_p0), %s3540_s7, 4294967232  ;;  %s3558_s28 = scalar_lea.sflag [#allocation12], %s3539_s22 }
 0x8dc   : > { %4818 = dma.done.wait (%p4537_p0), %s3558_s28, 64  }
 0x8dd   : > { %4820 = vsyncadd (%p4537_p0), %s3558_s28, 4294967232  ;;  %s3576_s3 = scalar_lea.sflag [#allocation15], %s3530_s17 }
 0x8de   : > { %4822 = dma.done.wait (%p4537_p0), %s3576_s3, 32  }
 0x8df   : > { %4824 = vsyncadd (%p4537_p0), %s3576_s3, 4294967264  ;;  %s6291_s15 = sld [smem:[#allocation54_spill]] }
 0x8e0   : > { %s6292_s7 = sld [smem:[#allocation51_spill]] }
 0x8e1   : > { %s6293_s10 = sld [smem:[#allocation52_spill]] }
 0x8e2   : > { %s6294_s11 = sld [smem:[#allocation55_spill]] }
 0x8e5   : > { %p95_p5 = scmp.ge.s32.totalorder %s6291_s15, 5  }
 0x8e7   :  { %97 = sbr.rel (!%p95_p5) target bundleno = 85 (0x55), region = 318 }
 0x8ec   :  { %3595 = vsyncpa [#allocation7], 1 }
 0x8ed   :  { %3597 = vsyncpa [#allocation7 + $0x1], 1 }
 0x8ee   :  { %3598 = vsyncpa [#allocation9], 1 }
 0x8ef   :  { %3600 = vsyncpa [#allocation9 + $0x1], 1 }
 0x8f0   :  { %3601 = vsyncpa [#allocation12], 1 }
 0x8f1   :  { %3603 = vsyncpa [#allocation12 + $0x1], 1 }
 0x8f2   :  { %3604 = vsyncpa [#allocation15], 1 }
 0x8f3   :  { %3606 = vsyncpa [#allocation15 + $0x1], 1 }

</bundles_post_ra>
